<compile_context>
chip_gen: v6e
topology: v6e:2x2x1
jax: 0.10.0
libtpu: 0.0.40
codegen_flags: <defaults>
</compile_context>

<pallas_src>
import functools
import math

import jax
import jax.numpy as jnp
from jax.experimental import pallas as pl
from jax.experimental.pallas import tpu as pltpu

EPS = 1e-5
KS = 3  # module defaults: ks=3, stride=1, padding=1


def _pick_tco(cout_p):
    # Full Cout per block when it fits; otherwise the largest multiple-of-8
    # divisor <= 128 (keeps the (8,128) BlockSpec rule and caps vreg pressure).
    if cout_p <= 128:
        return cout_p
    for cand in range(128, 7, -8):
        if cout_p % cand == 0:
            return cand
    return 8


def _fill_patches(x_ref, mask_ref, patch_ref, *, cin, hw, width, t, t_pad):
    """Assemble the im2col patch matrix (t_pad, hw) into VMEM scratch.

    x_ref:    (1, cin, (H+2)*W + 2)  height-padded, flattened input with a one
              element guard at each end, so every 3x3 tap is a static in-bounds
              lane slice of length H*W at offset ky*W + kx.
    mask_ref: (2, hw) multiplicative edge masks (row 0 zeros the x==0 lanes for
              kx==0 taps, row 1 zeros the x==W-1 lanes for kx==2 taps) -- these
              are exactly the positions that the missing width padding covers.
    """
    for ci in range(cin):
        for ky in range(KS):
            for kx in range(KS):
                tap = x_ref[0, pl.ds(ci, 1), pl.ds(ky * width + kx, hw)]  # (1, hw)
                if kx == 0:
                    tap = tap * mask_ref[0:1, :]
                elif kx == KS - 1:
                    tap = tap * mask_ref[1:2, :]
                patch_ref[pl.ds(ci * KS * KS + ky * KS + kx, 1), :] = tap
    if t_pad > t:
        # Zero the alignment rows once (their weights are also zero) so no
        # uninitialized VMEM (possible NaN bit patterns) reaches the MXU.
        patch_ref[pl.ds(t, t_pad - t), :] = jnp.zeros((t_pad - t, hw), jnp.float32)


def _conv_stats_kernel(x_ref, w_ref, mask_ref, stats_ref, patch_ref, *,
                       cin, hw, width, t, t_pad):
    # Pass 1: conv on the MXU + per-channel sum / sum-of-squares. The conv
    # output is NOT written back to HBM (it is recomputed, fused with BN+ReLU,
    # in pass 2), saving the f32 intermediate's write + read traffic.
    @pl.when(pl.program_id(1) == 0)
    def _build():
        _fill_patches(x_ref, mask_ref, patch_ref,
                      cin=cin, hw=hw, width=width, t=t, t_pad=t_pad)

    y = jnp.dot(w_ref[...], patch_ref[...],
                preferred_element_type=jnp.float32)              # (tco, hw), MXU
    stats_ref[0, :, 0:1] = jnp.sum(y, axis=1, keepdims=True)     # one stacked
    stats_ref[0, :, 1:2] = jnp.sum(y * y, axis=1, keepdims=True)  # XLU reduction


def _conv_bn_relu_kernel(x_ref, w_ref, mask_ref, scale_ref, bias_ref, o_ref,
                         patch_ref, *, cin, hw, width, t, t_pad):
    # Pass 2: recompute the cheap conv and fuse the folded BN affine + ReLU.
    @pl.when(pl.program_id(1) == 0)
    def _build():
        _fill_patches(x_ref, mask_ref, patch_ref,
                      cin=cin, hw=hw, width=width, t=t, t_pad=t_pad)

    y = jnp.dot(w_ref[...], patch_ref[...],
                preferred_element_type=jnp.float32)              # (tco, hw), MXU
    y = y * scale_ref[...] + bias_ref[...]                       # (tco,1) bcast
    o_ref[0] = jnp.maximum(y, 0.0).astype(o_ref.dtype)           # lane-dense vst


def conv_bn_relu(x, weight, gamma, beta, *, eps=EPS):
    """x: (N, Cin, H, W) NCHW; weight: (Cout, Cin, 3, 3); gamma/beta: (Cout,)."""
    n, cin, h, width = x.shape
    cout = weight.shape[0]
    hw = h * width
    flat = (h + 2) * width + 2  # height-padded, flattened, one-element guards

    # Pad Cout and Cin*9 to sublane multiples so matmul / block shapes align.
    cout_p = -(-cout // 8) * 8
    t = cin * KS * KS
    t_pad = -(-t // 8) * 8

    w_mat = weight.reshape(cout, t).astype(jnp.float32)
    w_mat = jnp.pad(w_mat, ((0, cout_p - cout), (0, t_pad - t)))
    g = jnp.pad(gamma.astype(jnp.float32), (0, cout_p - cout), constant_values=1.0)
    b = jnp.pad(beta.astype(jnp.float32), (0, cout_p - cout))

    tco = _pick_tco(cout_p)
    n_co = cout_p // tco

    # Height-only zero pad, flatten spatial, add one guard element at each end
    # so all nine 3x3 taps are in-bounds *static* lane slices; the missing width
    # padding is handled by the multiplicative edge masks below.
    xf = jnp.pad(x.astype(jnp.float32), ((0, 0), (0, 0), (1, 1), (0, 0)))
    xf = xf.reshape(n, cin, (h + 2) * width)
    xf = jnp.pad(xf, ((0, 0), (0, 0), (1, 1)))

    col = jnp.arange(hw, dtype=jnp.int32) % width
    mask = jnp.stack([col != 0, col != width - 1]).astype(jnp.float32)  # (2, hw)

    grid = (n, n_co)
    x_spec = pl.BlockSpec((1, cin, flat), lambda i, j: (i, 0, 0))
    w_spec = pl.BlockSpec((tco, t_pad), lambda i, j: (j, 0))
    m_spec = pl.BlockSpec((2, hw), lambda i, j: (0, 0))
    kern_args = dict(cin=cin, hw=hw, width=width, t=t, t_pad=t_pad)

    # ---- Pass 1: per-image, per-channel sum / sum-of-squares of the conv. ----
    stats = pl.pallas_call(
        functools.partial(_conv_stats_kernel, **kern_args),
        grid=grid,
        in_specs=[x_spec, w_spec, m_spec],
        out_specs=pl.BlockSpec((1, tco, 2), lambda i, j: (i, j, 0)),
        out_shape=jax.ShapeDtypeStruct((n, cout_p, 2), jnp.float32),
        scratch_shapes=[pltpu.VMEM((t_pad, hw), jnp.float32)],
        compiler_params=pltpu.CompilerParams(
            dimension_semantics=("parallel", "arbitrary")),
    )(xf, w_mat, mask)

    # Finish the batch statistics (tiny O(N*C) reduction) and fold the whole
    # BatchNorm affine transform into one per-channel scale/bias pair.
    # TODO(synk): for very large N*H*W switch to two-pass / Welford variance;
    # one-pass E[y^2]-E[y]^2 can cancel catastrophically at scale.
    cnt = n * hw
    mean = jnp.sum(stats[:, :, 0], axis=0) / cnt
    var = jnp.maximum(jnp.sum(stats[:, :, 1], axis=0) / cnt - mean * mean, 0.0)
    inv = jax.lax.rsqrt(var + eps)
    scale = (g * inv).reshape(cout_p, 1)
    bias = (b - mean * g * inv).reshape(cout_p, 1)

    # ---- Pass 2: recompute conv, apply folded BN + ReLU, lane-dense output. --
    out_flat = pl.pallas_call(
        functools.partial(_conv_bn_relu_kernel, **kern_args),
        grid=grid,
        in_specs=[x_spec, w_spec, m_spec,
                  pl.BlockSpec((tco, 1), lambda i, j: (j, 0)),
                  pl.BlockSpec((tco, 1), lambda i, j: (j, 0))],
        out_specs=pl.BlockSpec((1, tco, hw), lambda i, j: (i, j, 0)),
        out_shape=jax.ShapeDtypeStruct((n, cout_p, hw), x.dtype),
        scratch_shapes=[pltpu.VMEM((t_pad, hw), jnp.float32)],
        compiler_params=pltpu.CompilerParams(
            dimension_semantics=("parallel", "arbitrary")),
    )(xf, w_mat, mask, scale, bias)

    return out_flat[:, :cout, :].reshape(n, cout, h, width)


def conv_bn_relu_reference(x, weight, gamma, beta, eps=EPS):
    """Pure-JAX reference matching the PyTorch forward (training-mode BN)."""
    y = jax.lax.conv_general_dilated(
        x.astype(jnp.float32), weight.astype(jnp.float32),
        window_strides=(1, 1), padding=((1, 1), (1, 1)),
        dimension_numbers=("NCHW", "OIHW", "NCHW"),
        precision=jax.lax.Precision.HIGHEST)
    mean = jnp.mean(y, axis=(0, 2, 3), keepdims=True)
    var = jnp.mean((y - mean) ** 2, axis=(0, 2, 3), keepdims=True)
    yn = (y - mean) * jax.lax.rsqrt(var + eps)
    yn = yn * gamma.reshape(1, -1, 1, 1) + beta.reshape(1, -1, 1, 1)
    return jnp.maximum(yn, 0.0).astype(x.dtype)


if __name__ == "__main__":
    key = jax.random.PRNGKey(0)
    k_x, k_w, k_g, k_b = jax.random.split(key, 4)

    N, CIN, COUT, H, W = 2, 4, 4, 16, 16
    x = jax.random.normal(k_x, (N, CIN, H, W), dtype=jnp.float32)
    # Conv weights ~ kaiming_normal_(a=1): std = 1 / sqrt(Cin * ks * ks)
    weight = jax.random.normal(k_w, (COUT, CIN, KS, KS), dtype=jnp.float32)
    weight = weight / math.sqrt(CIN * KS * KS)
    # BatchNorm affine params (defaults gamma=1, beta=0; perturbed so the
    # affine path is exercised non-trivially while staying deterministic).
    gamma = 1.0 + 0.1 * jax.random.normal(k_g, (COUT,), dtype=jnp.float32)
    beta = 0.05 * jax.random.normal(k_b, (COUT,), dtype=jnp.float32)

    out = jax.jit(conv_bn_relu)(x, weight, gamma, beta)
    out = jax.block_until_ready(out)

    ref = conv_bn_relu_reference(x, weight, gamma, beta)
    assert out.shape == (N, COUT, H, W)
    max_err = float(jnp.max(jnp.abs(out - ref)))
    # Tolerance leaves headroom for the MXU's fp32 pass decomposition while
    # still catching any structural (padding / mask / stats) bug.
    assert max_err < 5e-3, f"max abs err {max_err}"
    print("KERNEL_OK")
</pallas_src>

<mosaic_0001>
module attributes {stable_mosaic.version = 11 : i64} {
  func.func @_conv_stats_kernel(%arg0: i32, %arg1: i32, %arg2: memref<1x4x290xf32, #tpu.memory_space<vmem>>, %arg3: memref<8x40xf32, #tpu.memory_space<vmem>>, %arg4: memref<2x256xf32, #tpu.memory_space<vmem>>, %arg5: memref<1x8x2xf32, #tpu.memory_space<vmem>>, %arg6: memref<40x256xf32, #tpu.memory_space<vmem>>) attributes {dimension_semantics = [#tpu.dimension_semantics<parallel>, #tpu.dimension_semantics<arbitrary>], iteration_bounds = array<i64: 2, 1>, scalar_prefetch = 0 : i64, scratch_operands = 1 : i64, tpu.core_type = #tpu.core_type<tc>, window_params = [{transform_indices = @transform_0, window_bounds = array<i64: 1, 4, 290>}, {transform_indices = @transform_1, window_bounds = array<i64: 8, 40>}, {pipeline_mode = #tpu.pipeline_mode<synchronous>, transform_indices = @transform_2, window_bounds = array<i64: 2, 256>}, {transform_indices = @transform_3, window_bounds = array<i64: 1, 8, 2>}]} {
    %c0_i32 = arith.constant 0 : i32
    %0 = arith.cmpi eq, %arg1, %c0_i32 : i32
    %1 = arith.extui %0 : i1 to i32
    %c0_i32_0 = arith.constant 0 : i32
    %2 = arith.cmpi ne, %1, %c0_i32_0 : i32
    scf.if %2 {
      %c0_11 = arith.constant 0 : index
      %c0_12 = arith.constant 0 : index
      %c0_13 = arith.constant 0 : index
      %17 = vector.load %arg2[%c0_11, %c0_12, %c0_13] : memref<1x4x290xf32, #tpu.memory_space<vmem>>, vector<1x1x256xf32>
      %18 = vector.shape_cast %17 : vector<1x1x256xf32> to vector<1x256xf32>
      %c0_14 = arith.constant 0 : index
      %c0_15 = arith.constant 0 : index
      %19 = vector.load %arg4[%c0_14, %c0_15] : memref<2x256xf32, #tpu.memory_space<vmem>>, vector<1x256xf32>
      %20 = arith.mulf %18, %19 : vector<1x256xf32>
      %c0_16 = arith.constant 0 : index
      %c0_17 = arith.constant 0 : index
      %21 = vector.load %arg6[%c0_16, %c0_17] : memref<40x256xf32, #tpu.memory_space<vmem>>, vector<1x256xf32>
      tpu.vector_store %arg6[%c0_16, %c0_17], %20 {strides = array<i32>} : memref<40x256xf32, #tpu.memory_space<vmem>>, vector<1x256xf32>,
      %c0_18 = arith.constant 0 : index
      %c0_19 = arith.constant 0 : index
      %c1_20 = arith.constant 1 : index
      %22 = vector.load %arg2[%c0_18, %c0_19, %c1_20] : memref<1x4x290xf32, #tpu.memory_space<vmem>>, vector<1x1x256xf32>
      %23 = vector.shape_cast %22 : vector<1x1x256xf32> to vector<1x256xf32>
      %c1_21 = arith.constant 1 : index
      %c0_22 = arith.constant 0 : index
      %24 = vector.load %arg6[%c1_21, %c0_22] : memref<40x256xf32, #tpu.memory_space<vmem>>, vector<1x256xf32>
      tpu.vector_store %arg6[%c1_21, %c0_22], %23 {strides = array<i32>} : memref<40x256xf32, #tpu.memory_space<vmem>>, vector<1x256xf32>,
      %c0_23 = arith.constant 0 : index
      %c0_24 = arith.constant 0 : index
      %c2 = arith.constant 2 : index
      %25 = vector.load %arg2[%c0_23, %c0_24, %c2] : memref<1x4x290xf32, #tpu.memory_space<vmem>>, vector<1x1x256xf32>
      %26 = vector.shape_cast %25 : vector<1x1x256xf32> to vector<1x256xf32>
      %c1_25 = arith.constant 1 : index
      %c0_26 = arith.constant 0 : index
      %27 = vector.load %arg4[%c1_25, %c0_26] : memref<2x256xf32, #tpu.memory_space<vmem>>, vector<1x256xf32>
      %28 = arith.mulf %26, %27 : vector<1x256xf32>
      %c2_27 = arith.constant 2 : index
      %c0_28 = arith.constant 0 : index
      %29 = vector.load %arg6[%c2_27, %c0_28] : memref<40x256xf32, #tpu.memory_space<vmem>>, vector<1x256xf32>
      tpu.vector_store %arg6[%c2_27, %c0_28], %28 {strides = array<i32>} : memref<40x256xf32, #tpu.memory_space<vmem>>, vector<1x256xf32>,
      %c0_29 = arith.constant 0 : index
      %c0_30 = arith.constant 0 : index
      %c16 = arith.constant 16 : index
      %30 = vector.load %arg2[%c0_29, %c0_30, %c16] : memref<1x4x290xf32, #tpu.memory_space<vmem>>, vector<1x1x256xf32>
      %31 = vector.shape_cast %30 : vector<1x1x256xf32> to vector<1x256xf32>
      %c0_31 = arith.constant 0 : index
      %c0_32 = arith.constant 0 : index
      %32 = vector.load %arg4[%c0_31, %c0_32] : memref<2x256xf32, #tpu.memory_space<vmem>>, vector<1x256xf32>
      %33 = arith.mulf %31, %32 : vector<1x256xf32>
      %c3 = arith.constant 3 : index
      %c0_33 = arith.constant 0 : index
      %34 = vector.load %arg6[%c3, %c0_33] : memref<40x256xf32, #tpu.memory_space<vmem>>, vector<1x256xf32>
      tpu.vector_store %arg6[%c3, %c0_33], %33 {strides = array<i32>} : memref<40x256xf32, #tpu.memory_space<vmem>>, vector<1x256xf32>,
      %c0_34 = arith.constant 0 : index
      %c0_35 = arith.constant 0 : index
      %c17 = arith.constant 17 : index
      %35 = vector.load %arg2[%c0_34, %c0_35, %c17] : memref<1x4x290xf32, #tpu.memory_space<vmem>>, vector<1x1x256xf32>
      %36 = vector.shape_cast %35 : vector<1x1x256xf32> to vector<1x256xf32>
      %c4 = arith.constant 4 : index
      %c0_36 = arith.constant 0 : index
      %37 = vector.load %arg6[%c4, %c0_36] : memref<40x256xf32, #tpu.memory_space<vmem>>, vector<1x256xf32>
      tpu.vector_store %arg6[%c4, %c0_36], %36 {strides = array<i32>} : memref<40x256xf32, #tpu.memory_space<vmem>>, vector<1x256xf32>,
      %c0_37 = arith.constant 0 : index
      %c0_38 = arith.constant 0 : index
      %c18 = arith.constant 18 : index
      %38 = vector.load %arg2[%c0_37, %c0_38, %c18] : memref<1x4x290xf32, #tpu.memory_space<vmem>>, vector<1x1x256xf32>
      %39 = vector.shape_cast %38 : vector<1x1x256xf32> to vector<1x256xf32>
      %c1_39 = arith.constant 1 : index
      %c0_40 = arith.constant 0 : index
      %40 = vector.load %arg4[%c1_39, %c0_40] : memref<2x256xf32, #tpu.memory_space<vmem>>, vector<1x256xf32>
      %41 = arith.mulf %39, %40 : vector<1x256xf32>
      %c5 = arith.constant 5 : index
      %c0_41 = arith.constant 0 : index
      %42 = vector.load %arg6[%c5, %c0_41] : memref<40x256xf32, #tpu.memory_space<vmem>>, vector<1x256xf32>
      tpu.vector_store %arg6[%c5, %c0_41], %41 {strides = array<i32>} : memref<40x256xf32, #tpu.memory_space<vmem>>, vector<1x256xf32>,
      %c0_42 = arith.constant 0 : index
      %c0_43 = arith.constant 0 : index
      %c32 = arith.constant 32 : index
      %43 = vector.load %arg2[%c0_42, %c0_43, %c32] : memref<1x4x290xf32, #tpu.memory_space<vmem>>, vector<1x1x256xf32>
      %44 = vector.shape_cast %43 : vector<1x1x256xf32> to vector<1x256xf32>
      %c0_44 = arith.constant 0 : index
      %c0_45 = arith.constant 0 : index
      %45 = vector.load %arg4[%c0_44, %c0_45] : memref<2x256xf32, #tpu.memory_space<vmem>>, vector<1x256xf32>
      %46 = arith.mulf %44, %45 : vector<1x256xf32>
      %c6 = arith.constant 6 : index
      %c0_46 = arith.constant 0 : index
      %47 = vector.load %arg6[%c6, %c0_46] : memref<40x256xf32, #tpu.memory_space<vmem>>, vector<1x256xf32>
      tpu.vector_store %arg6[%c6, %c0_46], %46 {strides = array<i32>} : memref<40x256xf32, #tpu.memory_space<vmem>>, vector<1x256xf32>,
      %c0_47 = arith.constant 0 : index
      %c0_48 = arith.constant 0 : index
      %c33 = arith.constant 33 : index
      %48 = vector.load %arg2[%c0_47, %c0_48, %c33] : memref<1x4x290xf32, #tpu.memory_space<vmem>>, vector<1x1x256xf32>
      %49 = vector.shape_cast %48 : vector<1x1x256xf32> to vector<1x256xf32>
      %c7 = arith.constant 7 : index
      %c0_49 = arith.constant 0 : index
      %50 = vector.load %arg6[%c7, %c0_49] : memref<40x256xf32, #tpu.memory_space<vmem>>, vector<1x256xf32>
      tpu.vector_store %arg6[%c7, %c0_49], %49 {strides = array<i32>} : memref<40x256xf32, #tpu.memory_space<vmem>>, vector<1x256xf32>,
      %c0_50 = arith.constant 0 : index
      %c0_51 = arith.constant 0 : index
      %c34 = arith.constant 34 : index
      %51 = vector.load %arg2[%c0_50, %c0_51, %c34] : memref<1x4x290xf32, #tpu.memory_space<vmem>>, vector<1x1x256xf32>
      %52 = vector.shape_cast %51 : vector<1x1x256xf32> to vector<1x256xf32>
      %c1_52 = arith.constant 1 : index
      %c0_53 = arith.constant 0 : index
      %53 = vector.load %arg4[%c1_52, %c0_53] : memref<2x256xf32, #tpu.memory_space<vmem>>, vector<1x256xf32>
      %54 = arith.mulf %52, %53 : vector<1x256xf32>
      %c8 = arith.constant 8 : index
      %c0_54 = arith.constant 0 : index
      %55 = vector.load %arg6[%c8, %c0_54] : memref<40x256xf32, #tpu.memory_space<vmem>>, vector<1x256xf32>
      tpu.vector_store %arg6[%c8, %c0_54], %54 {strides = array<i32>} : memref<40x256xf32, #tpu.memory_space<vmem>>, vector<1x256xf32>,
      %c0_55 = arith.constant 0 : index
      %c1_56 = arith.constant 1 : index
      %c0_57 = arith.constant 0 : index
      %56 = vector.load %arg2[%c0_55, %c1_56, %c0_57] : memref<1x4x290xf32, #tpu.memory_space<vmem>>, vector<1x1x256xf32>
      %57 = vector.shape_cast %56 : vector<1x1x256xf32> to vector<1x256xf32>
      %c0_58 = arith.constant 0 : index
      %c0_59 = arith.constant 0 : index
      %58 = vector.load %arg4[%c0_58, %c0_59] : memref<2x256xf32, #tpu.memory_space<vmem>>, vector<1x256xf32>
      %59 = arith.mulf %57, %58 : vector<1x256xf32>
      %c9 = arith.constant 9 : index
      %c0_60 = arith.constant 0 : index
      %60 = vector.load %arg6[%c9, %c0_60] : memref<40x256xf32, #tpu.memory_space<vmem>>, vector<1x256xf32>
      tpu.vector_store %arg6[%c9, %c0_60], %59 {strides = array<i32>} : memref<40x256xf32, #tpu.memory_space<vmem>>, vector<1x256xf32>,
      %c0_61 = arith.constant 0 : index
      %c1_62 = arith.constant 1 : index
      %c1_63 = arith.constant 1 : index
      %61 = vector.load %arg2[%c0_61, %c1_62, %c1_63] : memref<1x4x290xf32, #tpu.memory_space<vmem>>, vector<1x1x256xf32>
      %62 = vector.shape_cast %61 : vector<1x1x256xf32> to vector<1x256xf32>
      %c10 = arith.constant 10 : index
      %c0_64 = arith.constant 0 : index
      %63 = vector.load %arg6[%c10, %c0_64] : memref<40x256xf32, #tpu.memory_space<vmem>>, vector<1x256xf32>
      tpu.vector_store %arg6[%c10, %c0_64], %62 {strides = array<i32>} : memref<40x256xf32, #tpu.memory_space<vmem>>, vector<1x256xf32>,
      %c0_65 = arith.constant 0 : index
      %c1_66 = arith.constant 1 : index
      %c2_67 = arith.constant 2 : index
      %64 = vector.load %arg2[%c0_65, %c1_66, %c2_67] : memref<1x4x290xf32, #tpu.memory_space<vmem>>, vector<1x1x256xf32>
      %65 = vector.shape_cast %64 : vector<1x1x256xf32> to vector<1x256xf32>
      %c1_68 = arith.constant 1 : index
      %c0_69 = arith.constant 0 : index
      %66 = vector.load %arg4[%c1_68, %c0_69] : memref<2x256xf32, #tpu.memory_space<vmem>>, vector<1x256xf32>
      %67 = arith.mulf %65, %66 : vector<1x256xf32>
      %c11 = arith.constant 11 : index
      %c0_70 = arith.constant 0 : index
      %68 = vector.load %arg6[%c11, %c0_70] : memref<40x256xf32, #tpu.memory_space<vmem>>, vector<1x256xf32>
      tpu.vector_store %arg6[%c11, %c0_70], %67 {strides = array<i32>} : memref<40x256xf32, #tpu.memory_space<vmem>>, vector<1x256xf32>,
      %c0_71 = arith.constant 0 : index
      %c1_72 = arith.constant 1 : index
      %c16_73 = arith.constant 16 : index
      %69 = vector.load %arg2[%c0_71, %c1_72, %c16_73] : memref<1x4x290xf32, #tpu.memory_space<vmem>>, vector<1x1x256xf32>
      %70 = vector.shape_cast %69 : vector<1x1x256xf32> to vector<1x256xf32>
      %c0_74 = arith.constant 0 : index
      %c0_75 = arith.constant 0 : index
      %71 = vector.load %arg4[%c0_74, %c0_75] : memref<2x256xf32, #tpu.memory_space<vmem>>, vector<1x256xf32>
      %72 = arith.mulf %70, %71 : vector<1x256xf32>
      %c12 = arith.constant 12 : index
      %c0_76 = arith.constant 0 : index
      %73 = vector.load %arg6[%c12, %c0_76] : memref<40x256xf32, #tpu.memory_space<vmem>>, vector<1x256xf32>
      tpu.vector_store %arg6[%c12, %c0_76], %72 {strides = array<i32>} : memref<40x256xf32, #tpu.memory_space<vmem>>, vector<1x256xf32>,
      %c0_77 = arith.constant 0 : index
      %c1_78 = arith.constant 1 : index
      %c17_79 = arith.constant 17 : index
      %74 = vector.load %arg2[%c0_77, %c1_78, %c17_79] : memref<1x4x290xf32, #tpu.memory_space<vmem>>, vector<1x1x256xf32>
      %75 = vector.shape_cast %74 : vector<1x1x256xf32> to vector<1x256xf32>
      %c13 = arith.constant 13 : index
      %c0_80 = arith.constant 0 : index
      %76 = vector.load %arg6[%c13, %c0_80] : memref<40x256xf32, #tpu.memory_space<vmem>>, vector<1x256xf32>
      tpu.vector_store %arg6[%c13, %c0_80], %75 {strides = array<i32>} : memref<40x256xf32, #tpu.memory_space<vmem>>, vector<1x256xf32>,
      %c0_81 = arith.constant 0 : index
      %c1_82 = arith.constant 1 : index
      %c18_83 = arith.constant 18 : index
      %77 = vector.load %arg2[%c0_81, %c1_82, %c18_83] : memref<1x4x290xf32, #tpu.memory_space<vmem>>, vector<1x1x256xf32>
      %78 = vector.shape_cast %77 : vector<1x1x256xf32> to vector<1x256xf32>
      %c1_84 = arith.constant 1 : index
      %c0_85 = arith.constant 0 : index
      %79 = vector.load %arg4[%c1_84, %c0_85] : memref<2x256xf32, #tpu.memory_space<vmem>>, vector<1x256xf32>
      %80 = arith.mulf %78, %79 : vector<1x256xf32>
      %c14 = arith.constant 14 : index
      %c0_86 = arith.constant 0 : index
      %81 = vector.load %arg6[%c14, %c0_86] : memref<40x256xf32, #tpu.memory_space<vmem>>, vector<1x256xf32>
      tpu.vector_store %arg6[%c14, %c0_86], %80 {strides = array<i32>} : memref<40x256xf32, #tpu.memory_space<vmem>>, vector<1x256xf32>,
      %c0_87 = arith.constant 0 : index
      %c1_88 = arith.constant 1 : index
      %c32_89 = arith.constant 32 : index
      %82 = vector.load %arg2[%c0_87, %c1_88, %c32_89] : memref<1x4x290xf32, #tpu.memory_space<vmem>>, vector<1x1x256xf32>
      %83 = vector.shape_cast %82 : vector<1x1x256xf32> to vector<1x256xf32>
      %c0_90 = arith.constant 0 : index
      %c0_91 = arith.constant 0 : index
      %84 = vector.load %arg4[%c0_90, %c0_91] : memref<2x256xf32, #tpu.memory_space<vmem>>, vector<1x256xf32>
      %85 = arith.mulf %83, %84 : vector<1x256xf32>
      %c15 = arith.constant 15 : index
      %c0_92 = arith.constant 0 : index
      %86 = vector.load %arg6[%c15, %c0_92] : memref<40x256xf32, #tpu.memory_space<vmem>>, vector<1x256xf32>
      tpu.vector_store %arg6[%c15, %c0_92], %85 {strides = array<i32>} : memref<40x256xf32, #tpu.memory_space<vmem>>, vector<1x256xf32>,
      %c0_93 = arith.constant 0 : index
      %c1_94 = arith.constant 1 : index
      %c33_95 = arith.constant 33 : index
      %87 = vector.load %arg2[%c0_93, %c1_94, %c33_95] : memref<1x4x290xf32, #tpu.memory_space<vmem>>, vector<1x1x256xf32>
      %88 = vector.shape_cast %87 : vector<1x1x256xf32> to vector<1x256xf32>
      %c16_96 = arith.constant 16 : index
      %c0_97 = arith.constant 0 : index
      %89 = vector.load %arg6[%c16_96, %c0_97] : memref<40x256xf32, #tpu.memory_space<vmem>>, vector<1x256xf32>
      tpu.vector_store %arg6[%c16_96, %c0_97], %88 {strides = array<i32>} : memref<40x256xf32, #tpu.memory_space<vmem>>, vector<1x256xf32>,
      %c0_98 = arith.constant 0 : index
      %c1_99 = arith.constant 1 : index
      %c34_100 = arith.constant 34 : index
      %90 = vector.load %arg2[%c0_98, %c1_99, %c34_100] : memref<1x4x290xf32, #tpu.memory_space<vmem>>, vector<1x1x256xf32>
      %91 = vector.shape_cast %90 : vector<1x1x256xf32> to vector<1x256xf32>
      %c1_101 = arith.constant 1 : index
      %c0_102 = arith.constant 0 : index
      %92 = vector.load %arg4[%c1_101, %c0_102] : memref<2x256xf32, #tpu.memory_space<vmem>>, vector<1x256xf32>
      %93 = arith.mulf %91, %92 : vector<1x256xf32>
      %c17_103 = arith.constant 17 : index
      %c0_104 = arith.constant 0 : index
      %94 = vector.load %arg6[%c17_103, %c0_104] : memref<40x256xf32, #tpu.memory_space<vmem>>, vector<1x256xf32>
      tpu.vector_store %arg6[%c17_103, %c0_104], %93 {strides = array<i32>} : memref<40x256xf32, #tpu.memory_space<vmem>>, vector<1x256xf32>,
      %c0_105 = arith.constant 0 : index
      %c2_106 = arith.constant 2 : index
      %c0_107 = arith.constant 0 : index
      %95 = vector.load %arg2[%c0_105, %c2_106, %c0_107] : memref<1x4x290xf32, #tpu.memory_space<vmem>>, vector<1x1x256xf32>
      %96 = vector.shape_cast %95 : vector<1x1x256xf32> to vector<1x256xf32>
      %c0_108 = arith.constant 0 : index
      %c0_109 = arith.constant 0 : index
      %97 = vector.load %arg4[%c0_108, %c0_109] : memref<2x256xf32, #tpu.memory_space<vmem>>, vector<1x256xf32>
      %98 = arith.mulf %96, %97 : vector<1x256xf32>
      %c18_110 = arith.constant 18 : index
      %c0_111 = arith.constant 0 : index
      %99 = vector.load %arg6[%c18_110, %c0_111] : memref<40x256xf32, #tpu.memory_space<vmem>>, vector<1x256xf32>
      tpu.vector_store %arg6[%c18_110, %c0_111], %98 {strides = array<i32>} : memref<40x256xf32, #tpu.memory_space<vmem>>, vector<1x256xf32>,
      %c0_112 = arith.constant 0 : index
      %c2_113 = arith.constant 2 : index
      %c1_114 = arith.constant 1 : index
      %100 = vector.load %arg2[%c0_112, %c2_113, %c1_114] : memref<1x4x290xf32, #tpu.memory_space<vmem>>, vector<1x1x256xf32>
      %101 = vector.shape_cast %100 : vector<1x1x256xf32> to vector<1x256xf32>
      %c19 = arith.constant 19 : index
      %c0_115 = arith.constant 0 : index
      %102 = vector.load %arg6[%c19, %c0_115] : memref<40x256xf32, #tpu.memory_space<vmem>>, vector<1x256xf32>
      tpu.vector_store %arg6[%c19, %c0_115], %101 {strides = array<i32>} : memref<40x256xf32, #tpu.memory_space<vmem>>, vector<1x256xf32>,
      %c0_116 = arith.constant 0 : index
      %c2_117 = arith.constant 2 : index
      %c2_118 = arith.constant 2 : index
      %103 = vector.load %arg2[%c0_116, %c2_117, %c2_118] : memref<1x4x290xf32, #tpu.memory_space<vmem>>, vector<1x1x256xf32>
      %104 = vector.shape_cast %103 : vector<1x1x256xf32> to vector<1x256xf32>
      %c1_119 = arith.constant 1 : index
      %c0_120 = arith.constant 0 : index
      %105 = vector.load %arg4[%c1_119, %c0_120] : memref<2x256xf32, #tpu.memory_space<vmem>>, vector<1x256xf32>
      %106 = arith.mulf %104, %105 : vector<1x256xf32>
      %c20 = arith.constant 20 : index
      %c0_121 = arith.constant 0 : index
      %107 = vector.load %arg6[%c20, %c0_121] : memref<40x256xf32, #tpu.memory_space<vmem>>, vector<1x256xf32>
      tpu.vector_store %arg6[%c20, %c0_121], %106 {strides = array<i32>} : memref<40x256xf32, #tpu.memory_space<vmem>>, vector<1x256xf32>,
      %c0_122 = arith.constant 0 : index
      %c2_123 = arith.constant 2 : index
      %c16_124 = arith.constant 16 : index
      %108 = vector.load %arg2[%c0_122, %c2_123, %c16_124] : memref<1x4x290xf32, #tpu.memory_space<vmem>>, vector<1x1x256xf32>
      %109 = vector.shape_cast %108 : vector<1x1x256xf32> to vector<1x256xf32>
      %c0_125 = arith.constant 0 : index
      %c0_126 = arith.constant 0 : index
      %110 = vector.load %arg4[%c0_125, %c0_126] : memref<2x256xf32, #tpu.memory_space<vmem>>, vector<1x256xf32>
      %111 = arith.mulf %109, %110 : vector<1x256xf32>
      %c21 = arith.constant 21 : index
      %c0_127 = arith.constant 0 : index
      %112 = vector.load %arg6[%c21, %c0_127] : memref<40x256xf32, #tpu.memory_space<vmem>>, vector<1x256xf32>
      tpu.vector_store %arg6[%c21, %c0_127], %111 {strides = array<i32>} : memref<40x256xf32, #tpu.memory_space<vmem>>, vector<1x256xf32>,
      %c0_128 = arith.constant 0 : index
      %c2_129 = arith.constant 2 : index
      %c17_130 = arith.constant 17 : index
      %113 = vector.load %arg2[%c0_128, %c2_129, %c17_130] : memref<1x4x290xf32, #tpu.memory_space<vmem>>, vector<1x1x256xf32>
      %114 = vector.shape_cast %113 : vector<1x1x256xf32> to vector<1x256xf32>
      %c22 = arith.constant 22 : index
      %c0_131 = arith.constant 0 : index
      %115 = vector.load %arg6[%c22, %c0_131] : memref<40x256xf32, #tpu.memory_space<vmem>>, vector<1x256xf32>
      tpu.vector_store %arg6[%c22, %c0_131], %114 {strides = array<i32>} : memref<40x256xf32, #tpu.memory_space<vmem>>, vector<1x256xf32>,
      %c0_132 = arith.constant 0 : index
      %c2_133 = arith.constant 2 : index
      %c18_134 = arith.constant 18 : index
      %116 = vector.load %arg2[%c0_132, %c2_133, %c18_134] : memref<1x4x290xf32, #tpu.memory_space<vmem>>, vector<1x1x256xf32>
      %117 = vector.shape_cast %116 : vector<1x1x256xf32> to vector<1x256xf32>
      %c1_135 = arith.constant 1 : index
      %c0_136 = arith.constant 0 : index
      %118 = vector.load %arg4[%c1_135, %c0_136] : memref<2x256xf32, #tpu.memory_space<vmem>>, vector<1x256xf32>
      %119 = arith.mulf %117, %118 : vector<1x256xf32>
      %c23 = arith.constant 23 : index
      %c0_137 = arith.constant 0 : index
      %120 = vector.load %arg6[%c23, %c0_137] : memref<40x256xf32, #tpu.memory_space<vmem>>, vector<1x256xf32>
      tpu.vector_store %arg6[%c23, %c0_137], %119 {strides = array<i32>} : memref<40x256xf32, #tpu.memory_space<vmem>>, vector<1x256xf32>,
      %c0_138 = arith.constant 0 : index
      %c2_139 = arith.constant 2 : index
      %c32_140 = arith.constant 32 : index
      %121 = vector.load %arg2[%c0_138, %c2_139, %c32_140] : memref<1x4x290xf32, #tpu.memory_space<vmem>>, vector<1x1x256xf32>
      %122 = vector.shape_cast %121 : vector<1x1x256xf32> to vector<1x256xf32>
      %c0_141 = arith.constant 0 : index
      %c0_142 = arith.constant 0 : index
      %123 = vector.load %arg4[%c0_141, %c0_142] : memref<2x256xf32, #tpu.memory_space<vmem>>, vector<1x256xf32>
      %124 = arith.mulf %122, %123 : vector<1x256xf32>
      %c24 = arith.constant 24 : index
      %c0_143 = arith.constant 0 : index
      %125 = vector.load %arg6[%c24, %c0_143] : memref<40x256xf32, #tpu.memory_space<vmem>>, vector<1x256xf32>
      tpu.vector_store %arg6[%c24, %c0_143], %124 {strides = array<i32>} : memref<40x256xf32, #tpu.memory_space<vmem>>, vector<1x256xf32>,
      %c0_144 = arith.constant 0 : index
      %c2_145 = arith.constant 2 : index
      %c33_146 = arith.constant 33 : index
      %126 = vector.load %arg2[%c0_144, %c2_145, %c33_146] : memref<1x4x290xf32, #tpu.memory_space<vmem>>, vector<1x1x256xf32>
      %127 = vector.shape_cast %126 : vector<1x1x256xf32> to vector<1x256xf32>
      %c25 = arith.constant 25 : index
      %c0_147 = arith.constant 0 : index
      %128 = vector.load %arg6[%c25, %c0_147] : memref<40x256xf32, #tpu.memory_space<vmem>>, vector<1x256xf32>
      tpu.vector_store %arg6[%c25, %c0_147], %127 {strides = array<i32>} : memref<40x256xf32, #tpu.memory_space<vmem>>, vector<1x256xf32>,
      %c0_148 = arith.constant 0 : index
      %c2_149 = arith.constant 2 : index
      %c34_150 = arith.constant 34 : index
      %129 = vector.load %arg2[%c0_148, %c2_149, %c34_150] : memref<1x4x290xf32, #tpu.memory_space<vmem>>, vector<1x1x256xf32>
      %130 = vector.shape_cast %129 : vector<1x1x256xf32> to vector<1x256xf32>
      %c1_151 = arith.constant 1 : index
      %c0_152 = arith.constant 0 : index
      %131 = vector.load %arg4[%c1_151, %c0_152] : memref<2x256xf32, #tpu.memory_space<vmem>>, vector<1x256xf32>
      %132 = arith.mulf %130, %131 : vector<1x256xf32>
      %c26 = arith.constant 26 : index
      %c0_153 = arith.constant 0 : index
      %133 = vector.load %arg6[%c26, %c0_153] : memref<40x256xf32, #tpu.memory_space<vmem>>, vector<1x256xf32>
      tpu.vector_store %arg6[%c26, %c0_153], %132 {strides = array<i32>} : memref<40x256xf32, #tpu.memory_space<vmem>>, vector<1x256xf32>,
      %c0_154 = arith.constant 0 : index
      %c3_155 = arith.constant 3 : index
      %c0_156 = arith.constant 0 : index
      %134 = vector.load %arg2[%c0_154, %c3_155, %c0_156] : memref<1x4x290xf32, #tpu.memory_space<vmem>>, vector<1x1x256xf32>
      %135 = vector.shape_cast %134 : vector<1x1x256xf32> to vector<1x256xf32>
      %c0_157 = arith.constant 0 : index
      %c0_158 = arith.constant 0 : index
      %136 = vector.load %arg4[%c0_157, %c0_158] : memref<2x256xf32, #tpu.memory_space<vmem>>, vector<1x256xf32>
      %137 = arith.mulf %135, %136 : vector<1x256xf32>
      %c27 = arith.constant 27 : index
      %c0_159 = arith.constant 0 : index
      %138 = vector.load %arg6[%c27, %c0_159] : memref<40x256xf32, #tpu.memory_space<vmem>>, vector<1x256xf32>
      tpu.vector_store %arg6[%c27, %c0_159], %137 {strides = array<i32>} : memref<40x256xf32, #tpu.memory_space<vmem>>, vector<1x256xf32>,
      %c0_160 = arith.constant 0 : index
      %c3_161 = arith.constant 3 : index
      %c1_162 = arith.constant 1 : index
      %139 = vector.load %arg2[%c0_160, %c3_161, %c1_162] : memref<1x4x290xf32, #tpu.memory_space<vmem>>, vector<1x1x256xf32>
      %140 = vector.shape_cast %139 : vector<1x1x256xf32> to vector<1x256xf32>
      %c28 = arith.constant 28 : index
      %c0_163 = arith.constant 0 : index
      %141 = vector.load %arg6[%c28, %c0_163] : memref<40x256xf32, #tpu.memory_space<vmem>>, vector<1x256xf32>
      tpu.vector_store %arg6[%c28, %c0_163], %140 {strides = array<i32>} : memref<40x256xf32, #tpu.memory_space<vmem>>, vector<1x256xf32>,
      %c0_164 = arith.constant 0 : index
      %c3_165 = arith.constant 3 : index
      %c2_166 = arith.constant 2 : index
      %142 = vector.load %arg2[%c0_164, %c3_165, %c2_166] : memref<1x4x290xf32, #tpu.memory_space<vmem>>, vector<1x1x256xf32>
      %143 = vector.shape_cast %142 : vector<1x1x256xf32> to vector<1x256xf32>
      %c1_167 = arith.constant 1 : index
      %c0_168 = arith.constant 0 : index
      %144 = vector.load %arg4[%c1_167, %c0_168] : memref<2x256xf32, #tpu.memory_space<vmem>>, vector<1x256xf32>
      %145 = arith.mulf %143, %144 : vector<1x256xf32>
      %c29 = arith.constant 29 : index
      %c0_169 = arith.constant 0 : index
      %146 = vector.load %arg6[%c29, %c0_169] : memref<40x256xf32, #tpu.memory_space<vmem>>, vector<1x256xf32>
      tpu.vector_store %arg6[%c29, %c0_169], %145 {strides = array<i32>} : memref<40x256xf32, #tpu.memory_space<vmem>>, vector<1x256xf32>,
      %c0_170 = arith.constant 0 : index
      %c3_171 = arith.constant 3 : index
      %c16_172 = arith.constant 16 : index
      %147 = vector.load %arg2[%c0_170, %c3_171, %c16_172] : memref<1x4x290xf32, #tpu.memory_space<vmem>>, vector<1x1x256xf32>
      %148 = vector.shape_cast %147 : vector<1x1x256xf32> to vector<1x256xf32>
      %c0_173 = arith.constant 0 : index
      %c0_174 = arith.constant 0 : index
      %149 = vector.load %arg4[%c0_173, %c0_174] : memref<2x256xf32, #tpu.memory_space<vmem>>, vector<1x256xf32>
      %150 = arith.mulf %148, %149 : vector<1x256xf32>
      %c30 = arith.constant 30 : index
      %c0_175 = arith.constant 0 : index
      %151 = vector.load %arg6[%c30, %c0_175] : memref<40x256xf32, #tpu.memory_space<vmem>>, vector<1x256xf32>
      tpu.vector_store %arg6[%c30, %c0_175], %150 {strides = array<i32>} : memref<40x256xf32, #tpu.memory_space<vmem>>, vector<1x256xf32>,
      %c0_176 = arith.constant 0 : index
      %c3_177 = arith.constant 3 : index
      %c17_178 = arith.constant 17 : index
      %152 = vector.load %arg2[%c0_176, %c3_177, %c17_178] : memref<1x4x290xf32, #tpu.memory_space<vmem>>, vector<1x1x256xf32>
      %153 = vector.shape_cast %152 : vector<1x1x256xf32> to vector<1x256xf32>
      %c31 = arith.constant 31 : index
      %c0_179 = arith.constant 0 : index
      %154 = vector.load %arg6[%c31, %c0_179] : memref<40x256xf32, #tpu.memory_space<vmem>>, vector<1x256xf32>
      tpu.vector_store %arg6[%c31, %c0_179], %153 {strides = array<i32>} : memref<40x256xf32, #tpu.memory_space<vmem>>, vector<1x256xf32>,
      %c0_180 = arith.constant 0 : index
      %c3_181 = arith.constant 3 : index
      %c18_182 = arith.constant 18 : index
      %155 = vector.load %arg2[%c0_180, %c3_181, %c18_182] : memref<1x4x290xf32, #tpu.memory_space<vmem>>, vector<1x1x256xf32>
      %156 = vector.shape_cast %155 : vector<1x1x256xf32> to vector<1x256xf32>
      %c1_183 = arith.constant 1 : index
      %c0_184 = arith.constant 0 : index
      %157 = vector.load %arg4[%c1_183, %c0_184] : memref<2x256xf32, #tpu.memory_space<vmem>>, vector<1x256xf32>
      %158 = arith.mulf %156, %157 : vector<1x256xf32>
      %c32_185 = arith.constant 32 : index
      %c0_186 = arith.constant 0 : index
      %159 = vector.load %arg6[%c32_185, %c0_186] : memref<40x256xf32, #tpu.memory_space<vmem>>, vector<1x256xf32>
      tpu.vector_store %arg6[%c32_185, %c0_186], %158 {strides = array<i32>} : memref<40x256xf32, #tpu.memory_space<vmem>>, vector<1x256xf32>,
      %c0_187 = arith.constant 0 : index
      %c3_188 = arith.constant 3 : index
      %c32_189 = arith.constant 32 : index
      %160 = vector.load %arg2[%c0_187, %c3_188, %c32_189] : memref<1x4x290xf32, #tpu.memory_space<vmem>>, vector<1x1x256xf32>
      %161 = vector.shape_cast %160 : vector<1x1x256xf32> to vector<1x256xf32>
      %c0_190 = arith.constant 0 : index
      %c0_191 = arith.constant 0 : index
      %162 = vector.load %arg4[%c0_190, %c0_191] : memref<2x256xf32, #tpu.memory_space<vmem>>, vector<1x256xf32>
      %163 = arith.mulf %161, %162 : vector<1x256xf32>
      %c33_192 = arith.constant 33 : index
      %c0_193 = arith.constant 0 : index
      %164 = vector.load %arg6[%c33_192, %c0_193] : memref<40x256xf32, #tpu.memory_space<vmem>>, vector<1x256xf32>
      tpu.vector_store %arg6[%c33_192, %c0_193], %163 {strides = array<i32>} : memref<40x256xf32, #tpu.memory_space<vmem>>, vector<1x256xf32>,
      %c0_194 = arith.constant 0 : index
      %c3_195 = arith.constant 3 : index
      %c33_196 = arith.constant 33 : index
      %165 = vector.load %arg2[%c0_194, %c3_195, %c33_196] : memref<1x4x290xf32, #tpu.memory_space<vmem>>, vector<1x1x256xf32>
      %166 = vector.shape_cast %165 : vector<1x1x256xf32> to vector<1x256xf32>
      %c34_197 = arith.constant 34 : index
      %c0_198 = arith.constant 0 : index
      %167 = vector.load %arg6[%c34_197, %c0_198] : memref<40x256xf32, #tpu.memory_space<vmem>>, vector<1x256xf32>
      tpu.vector_store %arg6[%c34_197, %c0_198], %166 {strides = array<i32>} : memref<40x256xf32, #tpu.memory_space<vmem>>, vector<1x256xf32>,
      %c0_199 = arith.constant 0 : index
      %c3_200 = arith.constant 3 : index
      %c34_201 = arith.constant 34 : index
      %168 = vector.load %arg2[%c0_199, %c3_200, %c34_201] : memref<1x4x290xf32, #tpu.memory_space<vmem>>, vector<1x1x256xf32>
      %169 = vector.shape_cast %168 : vector<1x1x256xf32> to vector<1x256xf32>
      %c1_202 = arith.constant 1 : index
      %c0_203 = arith.constant 0 : index
      %170 = vector.load %arg4[%c1_202, %c0_203] : memref<2x256xf32, #tpu.memory_space<vmem>>, vector<1x256xf32>
      %171 = arith.mulf %169, %170 : vector<1x256xf32>
      %c35 = arith.constant 35 : index
      %c0_204 = arith.constant 0 : index
      %172 = vector.load %arg6[%c35, %c0_204] : memref<40x256xf32, #tpu.memory_space<vmem>>, vector<1x256xf32>
      tpu.vector_store %arg6[%c35, %c0_204], %171 {strides = array<i32>} : memref<40x256xf32, #tpu.memory_space<vmem>>, vector<1x256xf32>,
      %cst_205 = arith.constant 0.000000e+00 : f32
      %173 = vector.broadcast %cst_205 : f32 to vector<4x256xf32>
      %c36 = arith.constant 36 : index
      %c0_206 = arith.constant 0 : index
      %174 = vector.load %arg6[%c36, %c0_206] : memref<40x256xf32, #tpu.memory_space<vmem>>, vector<4x256xf32>
      tpu.vector_store %arg6[%c36, %c0_206], %173 {strides = array<i32>} : memref<40x256xf32, #tpu.memory_space<vmem>>, vector<4x256xf32>,
    } else {
    }
    %c0 = arith.constant 0 : index
    %c0_1 = arith.constant 0 : index
    %3 = vector.load %arg3[%c0, %c0_1] : memref<8x40xf32, #tpu.memory_space<vmem>>, vector<8x40xf32>
    %c0_2 = arith.constant 0 : index
    %c0_3 = arith.constant 0 : index
    %4 = vector.load %arg6[%c0_2, %c0_3] : memref<40x256xf32, #tpu.memory_space<vmem>>, vector<40x256xf32>
    %cst = arith.constant dense<0.000000e+00> : vector<8x256xf32>
    %5 = tpu.matmul %3, %4, %cst {dimension_numbers = #tpu.dot_dimension_numbers<[1], [0], [0], [1], [0, 0, 1, 1], [], []>} : vector<8x40xf32>, vector<40x256xf32>, vector<8x256xf32> -> vector<8x256xf32>
    %cst_4 = arith.constant dense<0.000000e+00> : vector<8xf32>
    %6 = vector.multi_reduction <add>, %5, %cst_4 [1] : vector<8x256xf32> to vector<8xf32>
    %7 = vector.shape_cast %6 : vector<8xf32> to vector<8x1xf32>
    %c0_5 = arith.constant 0 : index
    %c0_6 = arith.constant 0 : index
    %c0_7 = arith.constant 0 : index
    %8 = vector.load %arg5[%c0_5, %c0_6, %c0_7] : memref<1x8x2xf32, #tpu.memory_space<vmem>>, vector<1x8x1xf32>
    %9 = vector.shape_cast %8 : vector<1x8x1xf32> to vector<8x1xf32>
    %10 = vector.shape_cast %7 : vector<8x1xf32> to vector<1x8x1xf32>
    tpu.vector_store %arg5[%c0_5, %c0_6, %c0_7], %10 {strides = array<i32>} : memref<1x8x2xf32, #tpu.memory_space<vmem>>, vector<1x8x1xf32>,
    %11 = arith.mulf %5, %5 : vector<8x256xf32>
    %cst_8 = arith.constant dense<0.000000e+00> : vector<8xf32>
    %12 = vector.multi_reduction <add>, %11, %cst_8 [1] : vector<8x256xf32> to vector<8xf32>
    %13 = vector.shape_cast %12 : vector<8xf32> to vector<8x1xf32>
    %c0_9 = arith.constant 0 : index
    %c0_10 = arith.constant 0 : index
    %c1 = arith.constant 1 : index
    %14 = vector.load %arg5[%c0_9, %c0_10, %c1] : memref<1x8x2xf32, #tpu.memory_space<vmem>>, vector<1x8x1xf32>
    %15 = vector.shape_cast %14 : vector<1x8x1xf32> to vector<8x1xf32>
    %16 = vector.shape_cast %13 : vector<8x1xf32> to vector<1x8x1xf32>
    tpu.vector_store %arg5[%c0_9, %c0_10, %c1], %16 {strides = array<i32>} : memref<1x8x2xf32, #tpu.memory_space<vmem>>, vector<1x8x1xf32>,
    return
  }
  func.func @transform_0(%arg0: i32, %arg1: i32) -> (i32, i32, i32) {
    %c0_i32 = arith.constant 0 : i32
    %c0_i32_0 = arith.constant 0 : i32
    %c0_i32_1 = arith.constant 0 : i32
    return %arg0, %c0_i32, %c0_i32_0 : i32, i32, i32
  }
  func.func @transform_1(%arg0: i32, %arg1: i32) -> (i32, i32) {
    %c0_i32 = arith.constant 0 : i32
    %c0_i32_0 = arith.constant 0 : i32
    return %arg1, %c0_i32 : i32, i32
  }
  func.func @transform_2(%arg0: i32, %arg1: i32) -> (i32, i32) {
    %c0_i32 = arith.constant 0 : i32
    %c0_i32_0 = arith.constant 0 : i32
    %c0_i32_1 = arith.constant 0 : i32
    return %c0_i32, %c0_i32_0 : i32, i32
  }
  func.func @transform_3(%arg0: i32, %arg1: i32) -> (i32, i32, i32) {
    %c0_i32 = arith.constant 0 : i32
    %c0_i32_0 = arith.constant 0 : i32
    return %arg0, %arg1, %c0_i32 : i32, i32, i32
  }
}

module attributes {stable_mosaic.version = 11 : i64} {
  func.func @_conv_bn_relu_kernel(%arg0: i32, %arg1: i32, %arg2: memref<1x4x290xf32, #tpu.memory_space<vmem>>, %arg3: memref<8x40xf32, #tpu.memory_space<vmem>>, %arg4: memref<2x256xf32, #tpu.memory_space<vmem>>, %arg5: memref<8x1xf32, #tpu.memory_space<vmem>>, %arg6: memref<8x1xf32, #tpu.memory_space<vmem>>, %arg7: memref<1x8x256xf32, #tpu.memory_space<vmem>>, %arg8: memref<40x256xf32, #tpu.memory_space<vmem>>) attributes {dimension_semantics = [#tpu.dimension_semantics<parallel>, #tpu.dimension_semantics<arbitrary>], iteration_bounds = array<i64: 2, 1>, scalar_prefetch = 0 : i64, scratch_operands = 1 : i64, tpu.core_type = #tpu.core_type<tc>, window_params = [{transform_indices = @transform_0, window_bounds = array<i64: 1, 4, 290>}, {transform_indices = @transform_1, window_bounds = array<i64: 8, 40>}, {pipeline_mode = #tpu.pipeline_mode<synchronous>, transform_indices = @transform_2, window_bounds = array<i64: 2, 256>}, {transform_indices = @transform_3, window_bounds = array<i64: 8, 1>}, {transform_indices = @transform_4, window_bounds = array<i64: 8, 1>}, {transform_indices = @transform_5, window_bounds = array<i64: 1, 8, 256>}]} {
    %c0_i32 = arith.constant 0 : i32
    %0 = arith.cmpi eq, %arg1, %c0_i32 : i32
    %1 = arith.extui %0 : i1 to i32
    %c0_i32_0 = arith.constant 0 : i32
    %2 = arith.cmpi ne, %1, %c0_i32_0 : i32
    scf.if %2 {
      %c0_12 = arith.constant 0 : index
      %c0_13 = arith.constant 0 : index
      %c0_14 = arith.constant 0 : index
      %17 = vector.load %arg2[%c0_12, %c0_13, %c0_14] : memref<1x4x290xf32, #tpu.memory_space<vmem>>, vector<1x1x256xf32>
      %18 = vector.shape_cast %17 : vector<1x1x256xf32> to vector<1x256xf32>
      %c0_15 = arith.constant 0 : index
      %c0_16 = arith.constant 0 : index
      %19 = vector.load %arg4[%c0_15, %c0_16] : memref<2x256xf32, #tpu.memory_space<vmem>>, vector<1x256xf32>
      %20 = arith.mulf %18, %19 : vector<1x256xf32>
      %c0_17 = arith.constant 0 : index
      %c0_18 = arith.constant 0 : index
      %21 = vector.load %arg8[%c0_17, %c0_18] : memref<40x256xf32, #tpu.memory_space<vmem>>, vector<1x256xf32>
      tpu.vector_store %arg8[%c0_17, %c0_18], %20 {strides = array<i32>} : memref<40x256xf32, #tpu.memory_space<vmem>>, vector<1x256xf32>,
      %c0_19 = arith.constant 0 : index
      %c0_20 = arith.constant 0 : index
      %c1 = arith.constant 1 : index
      %22 = vector.load %arg2[%c0_19, %c0_20, %c1] : memref<1x4x290xf32, #tpu.memory_space<vmem>>, vector<1x1x256xf32>
      %23 = vector.shape_cast %22 : vector<1x1x256xf32> to vector<1x256xf32>
      %c1_21 = arith.constant 1 : index
      %c0_22 = arith.constant 0 : index
      %24 = vector.load %arg8[%c1_21, %c0_22] : memref<40x256xf32, #tpu.memory_space<vmem>>, vector<1x256xf32>
      tpu.vector_store %arg8[%c1_21, %c0_22], %23 {strides = array<i32>} : memref<40x256xf32, #tpu.memory_space<vmem>>, vector<1x256xf32>,
      %c0_23 = arith.constant 0 : index
      %c0_24 = arith.constant 0 : index
      %c2 = arith.constant 2 : index
      %25 = vector.load %arg2[%c0_23, %c0_24, %c2] : memref<1x4x290xf32, #tpu.memory_space<vmem>>, vector<1x1x256xf32>
      %26 = vector.shape_cast %25 : vector<1x1x256xf32> to vector<1x256xf32>
      %c1_25 = arith.constant 1 : index
      %c0_26 = arith.constant 0 : index
      %27 = vector.load %arg4[%c1_25, %c0_26] : memref<2x256xf32, #tpu.memory_space<vmem>>, vector<1x256xf32>
      %28 = arith.mulf %26, %27 : vector<1x256xf32>
      %c2_27 = arith.constant 2 : index
      %c0_28 = arith.constant 0 : index
      %29 = vector.load %arg8[%c2_27, %c0_28] : memref<40x256xf32, #tpu.memory_space<vmem>>, vector<1x256xf32>
      tpu.vector_store %arg8[%c2_27, %c0_28], %28 {strides = array<i32>} : memref<40x256xf32, #tpu.memory_space<vmem>>, vector<1x256xf32>,
      %c0_29 = arith.constant 0 : index
      %c0_30 = arith.constant 0 : index
      %c16 = arith.constant 16 : index
      %30 = vector.load %arg2[%c0_29, %c0_30, %c16] : memref<1x4x290xf32, #tpu.memory_space<vmem>>, vector<1x1x256xf32>
      %31 = vector.shape_cast %30 : vector<1x1x256xf32> to vector<1x256xf32>
      %c0_31 = arith.constant 0 : index
      %c0_32 = arith.constant 0 : index
      %32 = vector.load %arg4[%c0_31, %c0_32] : memref<2x256xf32, #tpu.memory_space<vmem>>, vector<1x256xf32>
      %33 = arith.mulf %31, %32 : vector<1x256xf32>
      %c3 = arith.constant 3 : index
      %c0_33 = arith.constant 0 : index
      %34 = vector.load %arg8[%c3, %c0_33] : memref<40x256xf32, #tpu.memory_space<vmem>>, vector<1x256xf32>
      tpu.vector_store %arg8[%c3, %c0_33], %33 {strides = array<i32>} : memref<40x256xf32, #tpu.memory_space<vmem>>, vector<1x256xf32>,
      %c0_34 = arith.constant 0 : index
      %c0_35 = arith.constant 0 : index
      %c17 = arith.constant 17 : index
      %35 = vector.load %arg2[%c0_34, %c0_35, %c17] : memref<1x4x290xf32, #tpu.memory_space<vmem>>, vector<1x1x256xf32>
      %36 = vector.shape_cast %35 : vector<1x1x256xf32> to vector<1x256xf32>
      %c4 = arith.constant 4 : index
      %c0_36 = arith.constant 0 : index
      %37 = vector.load %arg8[%c4, %c0_36] : memref<40x256xf32, #tpu.memory_space<vmem>>, vector<1x256xf32>
      tpu.vector_store %arg8[%c4, %c0_36], %36 {strides = array<i32>} : memref<40x256xf32, #tpu.memory_space<vmem>>, vector<1x256xf32>,
      %c0_37 = arith.constant 0 : index
      %c0_38 = arith.constant 0 : index
      %c18 = arith.constant 18 : index
      %38 = vector.load %arg2[%c0_37, %c0_38, %c18] : memref<1x4x290xf32, #tpu.memory_space<vmem>>, vector<1x1x256xf32>
      %39 = vector.shape_cast %38 : vector<1x1x256xf32> to vector<1x256xf32>
      %c1_39 = arith.constant 1 : index
      %c0_40 = arith.constant 0 : index
      %40 = vector.load %arg4[%c1_39, %c0_40] : memref<2x256xf32, #tpu.memory_space<vmem>>, vector<1x256xf32>
      %41 = arith.mulf %39, %40 : vector<1x256xf32>
      %c5 = arith.constant 5 : index
      %c0_41 = arith.constant 0 : index
      %42 = vector.load %arg8[%c5, %c0_41] : memref<40x256xf32, #tpu.memory_space<vmem>>, vector<1x256xf32>
      tpu.vector_store %arg8[%c5, %c0_41], %41 {strides = array<i32>} : memref<40x256xf32, #tpu.memory_space<vmem>>, vector<1x256xf32>,
      %c0_42 = arith.constant 0 : index
      %c0_43 = arith.constant 0 : index
      %c32 = arith.constant 32 : index
      %43 = vector.load %arg2[%c0_42, %c0_43, %c32] : memref<1x4x290xf32, #tpu.memory_space<vmem>>, vector<1x1x256xf32>
      %44 = vector.shape_cast %43 : vector<1x1x256xf32> to vector<1x256xf32>
      %c0_44 = arith.constant 0 : index
      %c0_45 = arith.constant 0 : index
      %45 = vector.load %arg4[%c0_44, %c0_45] : memref<2x256xf32, #tpu.memory_space<vmem>>, vector<1x256xf32>
      %46 = arith.mulf %44, %45 : vector<1x256xf32>
      %c6 = arith.constant 6 : index
      %c0_46 = arith.constant 0 : index
      %47 = vector.load %arg8[%c6, %c0_46] : memref<40x256xf32, #tpu.memory_space<vmem>>, vector<1x256xf32>
      tpu.vector_store %arg8[%c6, %c0_46], %46 {strides = array<i32>} : memref<40x256xf32, #tpu.memory_space<vmem>>, vector<1x256xf32>,
      %c0_47 = arith.constant 0 : index
      %c0_48 = arith.constant 0 : index
      %c33 = arith.constant 33 : index
      %48 = vector.load %arg2[%c0_47, %c0_48, %c33] : memref<1x4x290xf32, #tpu.memory_space<vmem>>, vector<1x1x256xf32>
      %49 = vector.shape_cast %48 : vector<1x1x256xf32> to vector<1x256xf32>
      %c7 = arith.constant 7 : index
      %c0_49 = arith.constant 0 : index
      %50 = vector.load %arg8[%c7, %c0_49] : memref<40x256xf32, #tpu.memory_space<vmem>>, vector<1x256xf32>
      tpu.vector_store %arg8[%c7, %c0_49], %49 {strides = array<i32>} : memref<40x256xf32, #tpu.memory_space<vmem>>, vector<1x256xf32>,
      %c0_50 = arith.constant 0 : index
      %c0_51 = arith.constant 0 : index
      %c34 = arith.constant 34 : index
      %51 = vector.load %arg2[%c0_50, %c0_51, %c34] : memref<1x4x290xf32, #tpu.memory_space<vmem>>, vector<1x1x256xf32>
      %52 = vector.shape_cast %51 : vector<1x1x256xf32> to vector<1x256xf32>
      %c1_52 = arith.constant 1 : index
      %c0_53 = arith.constant 0 : index
      %53 = vector.load %arg4[%c1_52, %c0_53] : memref<2x256xf32, #tpu.memory_space<vmem>>, vector<1x256xf32>
      %54 = arith.mulf %52, %53 : vector<1x256xf32>
      %c8 = arith.constant 8 : index
      %c0_54 = arith.constant 0 : index
      %55 = vector.load %arg8[%c8, %c0_54] : memref<40x256xf32, #tpu.memory_space<vmem>>, vector<1x256xf32>
      tpu.vector_store %arg8[%c8, %c0_54], %54 {strides = array<i32>} : memref<40x256xf32, #tpu.memory_space<vmem>>, vector<1x256xf32>,
      %c0_55 = arith.constant 0 : index
      %c1_56 = arith.constant 1 : index
      %c0_57 = arith.constant 0 : index
      %56 = vector.load %arg2[%c0_55, %c1_56, %c0_57] : memref<1x4x290xf32, #tpu.memory_space<vmem>>, vector<1x1x256xf32>
      %57 = vector.shape_cast %56 : vector<1x1x256xf32> to vector<1x256xf32>
      %c0_58 = arith.constant 0 : index
      %c0_59 = arith.constant 0 : index
      %58 = vector.load %arg4[%c0_58, %c0_59] : memref<2x256xf32, #tpu.memory_space<vmem>>, vector<1x256xf32>
      %59 = arith.mulf %57, %58 : vector<1x256xf32>
      %c9 = arith.constant 9 : index
      %c0_60 = arith.constant 0 : index
      %60 = vector.load %arg8[%c9, %c0_60] : memref<40x256xf32, #tpu.memory_space<vmem>>, vector<1x256xf32>
      tpu.vector_store %arg8[%c9, %c0_60], %59 {strides = array<i32>} : memref<40x256xf32, #tpu.memory_space<vmem>>, vector<1x256xf32>,
      %c0_61 = arith.constant 0 : index
      %c1_62 = arith.constant 1 : index
      %c1_63 = arith.constant 1 : index
      %61 = vector.load %arg2[%c0_61, %c1_62, %c1_63] : memref<1x4x290xf32, #tpu.memory_space<vmem>>, vector<1x1x256xf32>
      %62 = vector.shape_cast %61 : vector<1x1x256xf32> to vector<1x256xf32>
      %c10 = arith.constant 10 : index
      %c0_64 = arith.constant 0 : index
      %63 = vector.load %arg8[%c10, %c0_64] : memref<40x256xf32, #tpu.memory_space<vmem>>, vector<1x256xf32>
      tpu.vector_store %arg8[%c10, %c0_64], %62 {strides = array<i32>} : memref<40x256xf32, #tpu.memory_space<vmem>>, vector<1x256xf32>,
      %c0_65 = arith.constant 0 : index
      %c1_66 = arith.constant 1 : index
      %c2_67 = arith.constant 2 : index
      %64 = vector.load %arg2[%c0_65, %c1_66, %c2_67] : memref<1x4x290xf32, #tpu.memory_space<vmem>>, vector<1x1x256xf32>
      %65 = vector.shape_cast %64 : vector<1x1x256xf32> to vector<1x256xf32>
      %c1_68 = arith.constant 1 : index
      %c0_69 = arith.constant 0 : index
      %66 = vector.load %arg4[%c1_68, %c0_69] : memref<2x256xf32, #tpu.memory_space<vmem>>, vector<1x256xf32>
      %67 = arith.mulf %65, %66 : vector<1x256xf32>
      %c11 = arith.constant 11 : index
      %c0_70 = arith.constant 0 : index
      %68 = vector.load %arg8[%c11, %c0_70] : memref<40x256xf32, #tpu.memory_space<vmem>>, vector<1x256xf32>
      tpu.vector_store %arg8[%c11, %c0_70], %67 {strides = array<i32>} : memref<40x256xf32, #tpu.memory_space<vmem>>, vector<1x256xf32>,
      %c0_71 = arith.constant 0 : index
      %c1_72 = arith.constant 1 : index
      %c16_73 = arith.constant 16 : index
      %69 = vector.load %arg2[%c0_71, %c1_72, %c16_73] : memref<1x4x290xf32, #tpu.memory_space<vmem>>, vector<1x1x256xf32>
      %70 = vector.shape_cast %69 : vector<1x1x256xf32> to vector<1x256xf32>
      %c0_74 = arith.constant 0 : index
      %c0_75 = arith.constant 0 : index
      %71 = vector.load %arg4[%c0_74, %c0_75] : memref<2x256xf32, #tpu.memory_space<vmem>>, vector<1x256xf32>
      %72 = arith.mulf %70, %71 : vector<1x256xf32>
      %c12 = arith.constant 12 : index
      %c0_76 = arith.constant 0 : index
      %73 = vector.load %arg8[%c12, %c0_76] : memref<40x256xf32, #tpu.memory_space<vmem>>, vector<1x256xf32>
      tpu.vector_store %arg8[%c12, %c0_76], %72 {strides = array<i32>} : memref<40x256xf32, #tpu.memory_space<vmem>>, vector<1x256xf32>,
      %c0_77 = arith.constant 0 : index
      %c1_78 = arith.constant 1 : index
      %c17_79 = arith.constant 17 : index
      %74 = vector.load %arg2[%c0_77, %c1_78, %c17_79] : memref<1x4x290xf32, #tpu.memory_space<vmem>>, vector<1x1x256xf32>
      %75 = vector.shape_cast %74 : vector<1x1x256xf32> to vector<1x256xf32>
      %c13 = arith.constant 13 : index
      %c0_80 = arith.constant 0 : index
      %76 = vector.load %arg8[%c13, %c0_80] : memref<40x256xf32, #tpu.memory_space<vmem>>, vector<1x256xf32>
      tpu.vector_store %arg8[%c13, %c0_80], %75 {strides = array<i32>} : memref<40x256xf32, #tpu.memory_space<vmem>>, vector<1x256xf32>,
      %c0_81 = arith.constant 0 : index
      %c1_82 = arith.constant 1 : index
      %c18_83 = arith.constant 18 : index
      %77 = vector.load %arg2[%c0_81, %c1_82, %c18_83] : memref<1x4x290xf32, #tpu.memory_space<vmem>>, vector<1x1x256xf32>
      %78 = vector.shape_cast %77 : vector<1x1x256xf32> to vector<1x256xf32>
      %c1_84 = arith.constant 1 : index
      %c0_85 = arith.constant 0 : index
      %79 = vector.load %arg4[%c1_84, %c0_85] : memref<2x256xf32, #tpu.memory_space<vmem>>, vector<1x256xf32>
      %80 = arith.mulf %78, %79 : vector<1x256xf32>
      %c14 = arith.constant 14 : index
      %c0_86 = arith.constant 0 : index
      %81 = vector.load %arg8[%c14, %c0_86] : memref<40x256xf32, #tpu.memory_space<vmem>>, vector<1x256xf32>
      tpu.vector_store %arg8[%c14, %c0_86], %80 {strides = array<i32>} : memref<40x256xf32, #tpu.memory_space<vmem>>, vector<1x256xf32>,
      %c0_87 = arith.constant 0 : index
      %c1_88 = arith.constant 1 : index
      %c32_89 = arith.constant 32 : index
      %82 = vector.load %arg2[%c0_87, %c1_88, %c32_89] : memref<1x4x290xf32, #tpu.memory_space<vmem>>, vector<1x1x256xf32>
      %83 = vector.shape_cast %82 : vector<1x1x256xf32> to vector<1x256xf32>
      %c0_90 = arith.constant 0 : index
      %c0_91 = arith.constant 0 : index
      %84 = vector.load %arg4[%c0_90, %c0_91] : memref<2x256xf32, #tpu.memory_space<vmem>>, vector<1x256xf32>
      %85 = arith.mulf %83, %84 : vector<1x256xf32>
      %c15 = arith.constant 15 : index
      %c0_92 = arith.constant 0 : index
      %86 = vector.load %arg8[%c15, %c0_92] : memref<40x256xf32, #tpu.memory_space<vmem>>, vector<1x256xf32>
      tpu.vector_store %arg8[%c15, %c0_92], %85 {strides = array<i32>} : memref<40x256xf32, #tpu.memory_space<vmem>>, vector<1x256xf32>,
      %c0_93 = arith.constant 0 : index
      %c1_94 = arith.constant 1 : index
      %c33_95 = arith.constant 33 : index
      %87 = vector.load %arg2[%c0_93, %c1_94, %c33_95] : memref<1x4x290xf32, #tpu.memory_space<vmem>>, vector<1x1x256xf32>
      %88 = vector.shape_cast %87 : vector<1x1x256xf32> to vector<1x256xf32>
      %c16_96 = arith.constant 16 : index
      %c0_97 = arith.constant 0 : index
      %89 = vector.load %arg8[%c16_96, %c0_97] : memref<40x256xf32, #tpu.memory_space<vmem>>, vector<1x256xf32>
      tpu.vector_store %arg8[%c16_96, %c0_97], %88 {strides = array<i32>} : memref<40x256xf32, #tpu.memory_space<vmem>>, vector<1x256xf32>,
      %c0_98 = arith.constant 0 : index
      %c1_99 = arith.constant 1 : index
      %c34_100 = arith.constant 34 : index
      %90 = vector.load %arg2[%c0_98, %c1_99, %c34_100] : memref<1x4x290xf32, #tpu.memory_space<vmem>>, vector<1x1x256xf32>
      %91 = vector.shape_cast %90 : vector<1x1x256xf32> to vector<1x256xf32>
      %c1_101 = arith.constant 1 : index
      %c0_102 = arith.constant 0 : index
      %92 = vector.load %arg4[%c1_101, %c0_102] : memref<2x256xf32, #tpu.memory_space<vmem>>, vector<1x256xf32>
      %93 = arith.mulf %91, %92 : vector<1x256xf32>
      %c17_103 = arith.constant 17 : index
      %c0_104 = arith.constant 0 : index
      %94 = vector.load %arg8[%c17_103, %c0_104] : memref<40x256xf32, #tpu.memory_space<vmem>>, vector<1x256xf32>
      tpu.vector_store %arg8[%c17_103, %c0_104], %93 {strides = array<i32>} : memref<40x256xf32, #tpu.memory_space<vmem>>, vector<1x256xf32>,
      %c0_105 = arith.constant 0 : index
      %c2_106 = arith.constant 2 : index
      %c0_107 = arith.constant 0 : index
      %95 = vector.load %arg2[%c0_105, %c2_106, %c0_107] : memref<1x4x290xf32, #tpu.memory_space<vmem>>, vector<1x1x256xf32>
      %96 = vector.shape_cast %95 : vector<1x1x256xf32> to vector<1x256xf32>
      %c0_108 = arith.constant 0 : index
      %c0_109 = arith.constant 0 : index
      %97 = vector.load %arg4[%c0_108, %c0_109] : memref<2x256xf32, #tpu.memory_space<vmem>>, vector<1x256xf32>
      %98 = arith.mulf %96, %97 : vector<1x256xf32>
      %c18_110 = arith.constant 18 : index
      %c0_111 = arith.constant 0 : index
      %99 = vector.load %arg8[%c18_110, %c0_111] : memref<40x256xf32, #tpu.memory_space<vmem>>, vector<1x256xf32>
      tpu.vector_store %arg8[%c18_110, %c0_111], %98 {strides = array<i32>} : memref<40x256xf32, #tpu.memory_space<vmem>>, vector<1x256xf32>,
      %c0_112 = arith.constant 0 : index
      %c2_113 = arith.constant 2 : index
      %c1_114 = arith.constant 1 : index
      %100 = vector.load %arg2[%c0_112, %c2_113, %c1_114] : memref<1x4x290xf32, #tpu.memory_space<vmem>>, vector<1x1x256xf32>
      %101 = vector.shape_cast %100 : vector<1x1x256xf32> to vector<1x256xf32>
      %c19 = arith.constant 19 : index
      %c0_115 = arith.constant 0 : index
      %102 = vector.load %arg8[%c19, %c0_115] : memref<40x256xf32, #tpu.memory_space<vmem>>, vector<1x256xf32>
      tpu.vector_store %arg8[%c19, %c0_115], %101 {strides = array<i32>} : memref<40x256xf32, #tpu.memory_space<vmem>>, vector<1x256xf32>,
      %c0_116 = arith.constant 0 : index
      %c2_117 = arith.constant 2 : index
      %c2_118 = arith.constant 2 : index
      %103 = vector.load %arg2[%c0_116, %c2_117, %c2_118] : memref<1x4x290xf32, #tpu.memory_space<vmem>>, vector<1x1x256xf32>
      %104 = vector.shape_cast %103 : vector<1x1x256xf32> to vector<1x256xf32>
      %c1_119 = arith.constant 1 : index
      %c0_120 = arith.constant 0 : index
      %105 = vector.load %arg4[%c1_119, %c0_120] : memref<2x256xf32, #tpu.memory_space<vmem>>, vector<1x256xf32>
      %106 = arith.mulf %104, %105 : vector<1x256xf32>
      %c20 = arith.constant 20 : index
      %c0_121 = arith.constant 0 : index
      %107 = vector.load %arg8[%c20, %c0_121] : memref<40x256xf32, #tpu.memory_space<vmem>>, vector<1x256xf32>
      tpu.vector_store %arg8[%c20, %c0_121], %106 {strides = array<i32>} : memref<40x256xf32, #tpu.memory_space<vmem>>, vector<1x256xf32>,
      %c0_122 = arith.constant 0 : index
      %c2_123 = arith.constant 2 : index
      %c16_124 = arith.constant 16 : index
      %108 = vector.load %arg2[%c0_122, %c2_123, %c16_124] : memref<1x4x290xf32, #tpu.memory_space<vmem>>, vector<1x1x256xf32>
      %109 = vector.shape_cast %108 : vector<1x1x256xf32> to vector<1x256xf32>
      %c0_125 = arith.constant 0 : index
      %c0_126 = arith.constant 0 : index
      %110 = vector.load %arg4[%c0_125, %c0_126] : memref<2x256xf32, #tpu.memory_space<vmem>>, vector<1x256xf32>
      %111 = arith.mulf %109, %110 : vector<1x256xf32>
      %c21 = arith.constant 21 : index
      %c0_127 = arith.constant 0 : index
      %112 = vector.load %arg8[%c21, %c0_127] : memref<40x256xf32, #tpu.memory_space<vmem>>, vector<1x256xf32>
      tpu.vector_store %arg8[%c21, %c0_127], %111 {strides = array<i32>} : memref<40x256xf32, #tpu.memory_space<vmem>>, vector<1x256xf32>,
      %c0_128 = arith.constant 0 : index
      %c2_129 = arith.constant 2 : index
      %c17_130 = arith.constant 17 : index
      %113 = vector.load %arg2[%c0_128, %c2_129, %c17_130] : memref<1x4x290xf32, #tpu.memory_space<vmem>>, vector<1x1x256xf32>
      %114 = vector.shape_cast %113 : vector<1x1x256xf32> to vector<1x256xf32>
      %c22 = arith.constant 22 : index
      %c0_131 = arith.constant 0 : index
      %115 = vector.load %arg8[%c22, %c0_131] : memref<40x256xf32, #tpu.memory_space<vmem>>, vector<1x256xf32>
      tpu.vector_store %arg8[%c22, %c0_131], %114 {strides = array<i32>} : memref<40x256xf32, #tpu.memory_space<vmem>>, vector<1x256xf32>,
      %c0_132 = arith.constant 0 : index
      %c2_133 = arith.constant 2 : index
      %c18_134 = arith.constant 18 : index
      %116 = vector.load %arg2[%c0_132, %c2_133, %c18_134] : memref<1x4x290xf32, #tpu.memory_space<vmem>>, vector<1x1x256xf32>
      %117 = vector.shape_cast %116 : vector<1x1x256xf32> to vector<1x256xf32>
      %c1_135 = arith.constant 1 : index
      %c0_136 = arith.constant 0 : index
      %118 = vector.load %arg4[%c1_135, %c0_136] : memref<2x256xf32, #tpu.memory_space<vmem>>, vector<1x256xf32>
      %119 = arith.mulf %117, %118 : vector<1x256xf32>
      %c23 = arith.constant 23 : index
      %c0_137 = arith.constant 0 : index
      %120 = vector.load %arg8[%c23, %c0_137] : memref<40x256xf32, #tpu.memory_space<vmem>>, vector<1x256xf32>
      tpu.vector_store %arg8[%c23, %c0_137], %119 {strides = array<i32>} : memref<40x256xf32, #tpu.memory_space<vmem>>, vector<1x256xf32>,
      %c0_138 = arith.constant 0 : index
      %c2_139 = arith.constant 2 : index
      %c32_140 = arith.constant 32 : index
      %121 = vector.load %arg2[%c0_138, %c2_139, %c32_140] : memref<1x4x290xf32, #tpu.memory_space<vmem>>, vector<1x1x256xf32>
      %122 = vector.shape_cast %121 : vector<1x1x256xf32> to vector<1x256xf32>
      %c0_141 = arith.constant 0 : index
      %c0_142 = arith.constant 0 : index
      %123 = vector.load %arg4[%c0_141, %c0_142] : memref<2x256xf32, #tpu.memory_space<vmem>>, vector<1x256xf32>
      %124 = arith.mulf %122, %123 : vector<1x256xf32>
      %c24 = arith.constant 24 : index
      %c0_143 = arith.constant 0 : index
      %125 = vector.load %arg8[%c24, %c0_143] : memref<40x256xf32, #tpu.memory_space<vmem>>, vector<1x256xf32>
      tpu.vector_store %arg8[%c24, %c0_143], %124 {strides = array<i32>} : memref<40x256xf32, #tpu.memory_space<vmem>>, vector<1x256xf32>,
      %c0_144 = arith.constant 0 : index
      %c2_145 = arith.constant 2 : index
      %c33_146 = arith.constant 33 : index
      %126 = vector.load %arg2[%c0_144, %c2_145, %c33_146] : memref<1x4x290xf32, #tpu.memory_space<vmem>>, vector<1x1x256xf32>
      %127 = vector.shape_cast %126 : vector<1x1x256xf32> to vector<1x256xf32>
      %c25 = arith.constant 25 : index
      %c0_147 = arith.constant 0 : index
      %128 = vector.load %arg8[%c25, %c0_147] : memref<40x256xf32, #tpu.memory_space<vmem>>, vector<1x256xf32>
      tpu.vector_store %arg8[%c25, %c0_147], %127 {strides = array<i32>} : memref<40x256xf32, #tpu.memory_space<vmem>>, vector<1x256xf32>,
      %c0_148 = arith.constant 0 : index
      %c2_149 = arith.constant 2 : index
      %c34_150 = arith.constant 34 : index
      %129 = vector.load %arg2[%c0_148, %c2_149, %c34_150] : memref<1x4x290xf32, #tpu.memory_space<vmem>>, vector<1x1x256xf32>
      %130 = vector.shape_cast %129 : vector<1x1x256xf32> to vector<1x256xf32>
      %c1_151 = arith.constant 1 : index
      %c0_152 = arith.constant 0 : index
      %131 = vector.load %arg4[%c1_151, %c0_152] : memref<2x256xf32, #tpu.memory_space<vmem>>, vector<1x256xf32>
      %132 = arith.mulf %130, %131 : vector<1x256xf32>
      %c26 = arith.constant 26 : index
      %c0_153 = arith.constant 0 : index
      %133 = vector.load %arg8[%c26, %c0_153] : memref<40x256xf32, #tpu.memory_space<vmem>>, vector<1x256xf32>
      tpu.vector_store %arg8[%c26, %c0_153], %132 {strides = array<i32>} : memref<40x256xf32, #tpu.memory_space<vmem>>, vector<1x256xf32>,
      %c0_154 = arith.constant 0 : index
      %c3_155 = arith.constant 3 : index
      %c0_156 = arith.constant 0 : index
      %134 = vector.load %arg2[%c0_154, %c3_155, %c0_156] : memref<1x4x290xf32, #tpu.memory_space<vmem>>, vector<1x1x256xf32>
      %135 = vector.shape_cast %134 : vector<1x1x256xf32> to vector<1x256xf32>
      %c0_157 = arith.constant 0 : index
      %c0_158 = arith.constant 0 : index
      %136 = vector.load %arg4[%c0_157, %c0_158] : memref<2x256xf32, #tpu.memory_space<vmem>>, vector<1x256xf32>
      %137 = arith.mulf %135, %136 : vector<1x256xf32>
      %c27 = arith.constant 27 : index
      %c0_159 = arith.constant 0 : index
      %138 = vector.load %arg8[%c27, %c0_159] : memref<40x256xf32, #tpu.memory_space<vmem>>, vector<1x256xf32>
      tpu.vector_store %arg8[%c27, %c0_159], %137 {strides = array<i32>} : memref<40x256xf32, #tpu.memory_space<vmem>>, vector<1x256xf32>,
      %c0_160 = arith.constant 0 : index
      %c3_161 = arith.constant 3 : index
      %c1_162 = arith.constant 1 : index
      %139 = vector.load %arg2[%c0_160, %c3_161, %c1_162] : memref<1x4x290xf32, #tpu.memory_space<vmem>>, vector<1x1x256xf32>
      %140 = vector.shape_cast %139 : vector<1x1x256xf32> to vector<1x256xf32>
      %c28 = arith.constant 28 : index
      %c0_163 = arith.constant 0 : index
      %141 = vector.load %arg8[%c28, %c0_163] : memref<40x256xf32, #tpu.memory_space<vmem>>, vector<1x256xf32>
      tpu.vector_store %arg8[%c28, %c0_163], %140 {strides = array<i32>} : memref<40x256xf32, #tpu.memory_space<vmem>>, vector<1x256xf32>,
      %c0_164 = arith.constant 0 : index
      %c3_165 = arith.constant 3 : index
      %c2_166 = arith.constant 2 : index
      %142 = vector.load %arg2[%c0_164, %c3_165, %c2_166] : memref<1x4x290xf32, #tpu.memory_space<vmem>>, vector<1x1x256xf32>
      %143 = vector.shape_cast %142 : vector<1x1x256xf32> to vector<1x256xf32>
      %c1_167 = arith.constant 1 : index
      %c0_168 = arith.constant 0 : index
      %144 = vector.load %arg4[%c1_167, %c0_168] : memref<2x256xf32, #tpu.memory_space<vmem>>, vector<1x256xf32>
      %145 = arith.mulf %143, %144 : vector<1x256xf32>
      %c29 = arith.constant 29 : index
      %c0_169 = arith.constant 0 : index
      %146 = vector.load %arg8[%c29, %c0_169] : memref<40x256xf32, #tpu.memory_space<vmem>>, vector<1x256xf32>
      tpu.vector_store %arg8[%c29, %c0_169], %145 {strides = array<i32>} : memref<40x256xf32, #tpu.memory_space<vmem>>, vector<1x256xf32>,
      %c0_170 = arith.constant 0 : index
      %c3_171 = arith.constant 3 : index
      %c16_172 = arith.constant 16 : index
      %147 = vector.load %arg2[%c0_170, %c3_171, %c16_172] : memref<1x4x290xf32, #tpu.memory_space<vmem>>, vector<1x1x256xf32>
      %148 = vector.shape_cast %147 : vector<1x1x256xf32> to vector<1x256xf32>
      %c0_173 = arith.constant 0 : index
      %c0_174 = arith.constant 0 : index
      %149 = vector.load %arg4[%c0_173, %c0_174] : memref<2x256xf32, #tpu.memory_space<vmem>>, vector<1x256xf32>
      %150 = arith.mulf %148, %149 : vector<1x256xf32>
      %c30 = arith.constant 30 : index
      %c0_175 = arith.constant 0 : index
      %151 = vector.load %arg8[%c30, %c0_175] : memref<40x256xf32, #tpu.memory_space<vmem>>, vector<1x256xf32>
      tpu.vector_store %arg8[%c30, %c0_175], %150 {strides = array<i32>} : memref<40x256xf32, #tpu.memory_space<vmem>>, vector<1x256xf32>,
      %c0_176 = arith.constant 0 : index
      %c3_177 = arith.constant 3 : index
      %c17_178 = arith.constant 17 : index
      %152 = vector.load %arg2[%c0_176, %c3_177, %c17_178] : memref<1x4x290xf32, #tpu.memory_space<vmem>>, vector<1x1x256xf32>
      %153 = vector.shape_cast %152 : vector<1x1x256xf32> to vector<1x256xf32>
      %c31 = arith.constant 31 : index
      %c0_179 = arith.constant 0 : index
      %154 = vector.load %arg8[%c31, %c0_179] : memref<40x256xf32, #tpu.memory_space<vmem>>, vector<1x256xf32>
      tpu.vector_store %arg8[%c31, %c0_179], %153 {strides = array<i32>} : memref<40x256xf32, #tpu.memory_space<vmem>>, vector<1x256xf32>,
      %c0_180 = arith.constant 0 : index
      %c3_181 = arith.constant 3 : index
      %c18_182 = arith.constant 18 : index
      %155 = vector.load %arg2[%c0_180, %c3_181, %c18_182] : memref<1x4x290xf32, #tpu.memory_space<vmem>>, vector<1x1x256xf32>
      %156 = vector.shape_cast %155 : vector<1x1x256xf32> to vector<1x256xf32>
      %c1_183 = arith.constant 1 : index
      %c0_184 = arith.constant 0 : index
      %157 = vector.load %arg4[%c1_183, %c0_184] : memref<2x256xf32, #tpu.memory_space<vmem>>, vector<1x256xf32>
      %158 = arith.mulf %156, %157 : vector<1x256xf32>
      %c32_185 = arith.constant 32 : index
      %c0_186 = arith.constant 0 : index
      %159 = vector.load %arg8[%c32_185, %c0_186] : memref<40x256xf32, #tpu.memory_space<vmem>>, vector<1x256xf32>
      tpu.vector_store %arg8[%c32_185, %c0_186], %158 {strides = array<i32>} : memref<40x256xf32, #tpu.memory_space<vmem>>, vector<1x256xf32>,
      %c0_187 = arith.constant 0 : index
      %c3_188 = arith.constant 3 : index
      %c32_189 = arith.constant 32 : index
      %160 = vector.load %arg2[%c0_187, %c3_188, %c32_189] : memref<1x4x290xf32, #tpu.memory_space<vmem>>, vector<1x1x256xf32>
      %161 = vector.shape_cast %160 : vector<1x1x256xf32> to vector<1x256xf32>
      %c0_190 = arith.constant 0 : index
      %c0_191 = arith.constant 0 : index
      %162 = vector.load %arg4[%c0_190, %c0_191] : memref<2x256xf32, #tpu.memory_space<vmem>>, vector<1x256xf32>
      %163 = arith.mulf %161, %162 : vector<1x256xf32>
      %c33_192 = arith.constant 33 : index
      %c0_193 = arith.constant 0 : index
      %164 = vector.load %arg8[%c33_192, %c0_193] : memref<40x256xf32, #tpu.memory_space<vmem>>, vector<1x256xf32>
      tpu.vector_store %arg8[%c33_192, %c0_193], %163 {strides = array<i32>} : memref<40x256xf32, #tpu.memory_space<vmem>>, vector<1x256xf32>,
      %c0_194 = arith.constant 0 : index
      %c3_195 = arith.constant 3 : index
      %c33_196 = arith.constant 33 : index
      %165 = vector.load %arg2[%c0_194, %c3_195, %c33_196] : memref<1x4x290xf32, #tpu.memory_space<vmem>>, vector<1x1x256xf32>
      %166 = vector.shape_cast %165 : vector<1x1x256xf32> to vector<1x256xf32>
      %c34_197 = arith.constant 34 : index
      %c0_198 = arith.constant 0 : index
      %167 = vector.load %arg8[%c34_197, %c0_198] : memref<40x256xf32, #tpu.memory_space<vmem>>, vector<1x256xf32>
      tpu.vector_store %arg8[%c34_197, %c0_198], %166 {strides = array<i32>} : memref<40x256xf32, #tpu.memory_space<vmem>>, vector<1x256xf32>,
      %c0_199 = arith.constant 0 : index
      %c3_200 = arith.constant 3 : index
      %c34_201 = arith.constant 34 : index
      %168 = vector.load %arg2[%c0_199, %c3_200, %c34_201] : memref<1x4x290xf32, #tpu.memory_space<vmem>>, vector<1x1x256xf32>
      %169 = vector.shape_cast %168 : vector<1x1x256xf32> to vector<1x256xf32>
      %c1_202 = arith.constant 1 : index
      %c0_203 = arith.constant 0 : index
      %170 = vector.load %arg4[%c1_202, %c0_203] : memref<2x256xf32, #tpu.memory_space<vmem>>, vector<1x256xf32>
      %171 = arith.mulf %169, %170 : vector<1x256xf32>
      %c35 = arith.constant 35 : index
      %c0_204 = arith.constant 0 : index
      %172 = vector.load %arg8[%c35, %c0_204] : memref<40x256xf32, #tpu.memory_space<vmem>>, vector<1x256xf32>
      tpu.vector_store %arg8[%c35, %c0_204], %171 {strides = array<i32>} : memref<40x256xf32, #tpu.memory_space<vmem>>, vector<1x256xf32>,
      %cst_205 = arith.constant 0.000000e+00 : f32
      %173 = vector.broadcast %cst_205 : f32 to vector<4x256xf32>
      %c36 = arith.constant 36 : index
      %c0_206 = arith.constant 0 : index
      %174 = vector.load %arg8[%c36, %c0_206] : memref<40x256xf32, #tpu.memory_space<vmem>>, vector<4x256xf32>
      tpu.vector_store %arg8[%c36, %c0_206], %173 {strides = array<i32>} : memref<40x256xf32, #tpu.memory_space<vmem>>, vector<4x256xf32>,
    } else {
    }
    %c0 = arith.constant 0 : index
    %c0_1 = arith.constant 0 : index
    %3 = vector.load %arg3[%c0, %c0_1] : memref<8x40xf32, #tpu.memory_space<vmem>>, vector<8x40xf32>
    %c0_2 = arith.constant 0 : index
    %c0_3 = arith.constant 0 : index
    %4 = vector.load %arg8[%c0_2, %c0_3] : memref<40x256xf32, #tpu.memory_space<vmem>>, vector<40x256xf32>
    %cst = arith.constant dense<0.000000e+00> : vector<8x256xf32>
    %5 = tpu.matmul %3, %4, %cst {dimension_numbers = #tpu.dot_dimension_numbers<[1], [0], [0], [1], [0, 0, 1, 1], [], []>} : vector<8x40xf32>, vector<40x256xf32>, vector<8x256xf32> -> vector<8x256xf32>
    %c0_4 = arith.constant 0 : index
    %c0_5 = arith.constant 0 : index
    %6 = vector.load %arg5[%c0_4, %c0_5] : memref<8x1xf32, #tpu.memory_space<vmem>>, vector<8x1xf32>
    %7 = vector.broadcast %6 : vector<8x1xf32> to vector<8x256xf32>
    %8 = arith.mulf %5, %7 : vector<8x256xf32>
    %c0_6 = arith.constant 0 : index
    %c0_7 = arith.constant 0 : index
    %9 = vector.load %arg6[%c0_6, %c0_7] : memref<8x1xf32, #tpu.memory_space<vmem>>, vector<8x1xf32>
    %10 = vector.broadcast %9 : vector<8x1xf32> to vector<8x256xf32>
    %11 = arith.addf %8, %10 : vector<8x256xf32>
    %cst_8 = arith.constant 0.000000e+00 : f32
    %12 = vector.broadcast %cst_8 : f32 to vector<8x256xf32>
    %13 = arith.maximumf %11, %12 : vector<8x256xf32>
    %c0_9 = arith.constant 0 : index
    %c0_10 = arith.constant 0 : index
    %c0_11 = arith.constant 0 : index
    %14 = vector.load %arg7[%c0_9, %c0_10, %c0_11] : memref<1x8x256xf32, #tpu.memory_space<vmem>>, vector<1x8x256xf32>
    %15 = vector.shape_cast %14 : vector<1x8x256xf32> to vector<8x256xf32>
    %16 = vector.shape_cast %13 : vector<8x256xf32> to vector<1x8x256xf32>
    tpu.vector_store %arg7[%c0_9, %c0_10, %c0_11], %16 {strides = array<i32>} : memref<1x8x256xf32, #tpu.memory_space<vmem>>, vector<1x8x256xf32>,
    return
  }
  func.func @transform_0(%arg0: i32, %arg1: i32) -> (i32, i32, i32) {
    %c0_i32 = arith.constant 0 : i32
    %c0_i32_0 = arith.constant 0 : i32
    %c0_i32_1 = arith.constant 0 : i32
    return %arg0, %c0_i32, %c0_i32_0 : i32, i32, i32
  }
  func.func @transform_1(%arg0: i32, %arg1: i32) -> (i32, i32) {
    %c0_i32 = arith.constant 0 : i32
    %c0_i32_0 = arith.constant 0 : i32
    return %arg1, %c0_i32 : i32, i32
  }
  func.func @transform_2(%arg0: i32, %arg1: i32) -> (i32, i32) {
    %c0_i32 = arith.constant 0 : i32
    %c0_i32_0 = arith.constant 0 : i32
    %c0_i32_1 = arith.constant 0 : i32
    return %c0_i32, %c0_i32_0 : i32, i32
  }
  func.func @transform_3(%arg0: i32, %arg1: i32) -> (i32, i32) {
    %c0_i32 = arith.constant 0 : i32
    %c0_i32_0 = arith.constant 0 : i32
    return %arg1, %c0_i32 : i32, i32
  }
  func.func @transform_4(%arg0: i32, %arg1: i32) -> (i32, i32) {
    %c0_i32 = arith.constant 0 : i32
    %c0_i32_0 = arith.constant 0 : i32
    return %arg1, %c0_i32 : i32, i32
  }
  func.func @transform_5(%arg0: i32, %arg1: i32) -> (i32, i32, i32) {
    %c0_i32 = arith.constant 0 : i32
    %c0_i32_0 = arith.constant 0 : i32
    return %arg0, %arg1, %c0_i32 : i32, i32, i32
  }
}

</mosaic_0001>

<bundles_post_ra>
// kernel: conv_bn_relu.2
= control target key start
LH: loop header
LB: loop body
LE: loop exit
PB: predicated region body
PF: predicated region fallthrough
CT: control target
= control target key end

     0   :  { %s1068_s12 = smov 0   ;;  %s1070_s13 = smov 0   ;;  %s1386_s0 = inlined_call_operand.vmem [shape: f32[2,4,290], index: 0, kind: input, shape index: {}]   ;;  %s1387_s1 = inlined_call_operand.vmem [shape: f32[8,40], index: 1, kind: input, shape index: {}]   ;;  %s1388_s2 = inlined_call_operand.vmem [shape: f32[2,256], index: 2, kind: input, shape index: {}]   ;;  %s1389_s3 = inlined_call_operand.vmem [shape: f32[2,8,2], index: 3, kind: output, shape index: {}]  }
   0x1   :  { %s1072_s14 = smov 0  }
   0x2 LB: > { %s25_s15 = sadd.s32 1, %s1028_s13  ;;  %p926_p0 = scmp.ge.s32.totalorder %s1032_s14, 1  ;;  %s1032_s14 = sphi %s1072_s14, %s13_s14   ;;  %s1028_s13 = sphi %s1070_s13, %s1393_s13   ;;  %s1024_s12 = sphi %s1068_s12, %s1392_s12  }
   0x3   : > { %p27_p1 = scmp.ge.s32.totalorder %s25_s15, 2  ;;  %p160_p2 = scmp.lt.s32.totalorder %s1032_s14, 3 }
   0x5   : > { %s1395_s15 = smov (%p27_p1, %s25_s15), 0  ;;  %p161_p3 = pnand %p926_p0, %p160_p2 }
   0x6   : > { %s1034_s18 = smov (!%p161_p3), 34   ;;  %s1035_s21 = smov (!%p161_p3), 18  }
   0x7   : > { %164 = sbr.rel (%p161_p3) target bundleno = 640 (0x280), region = 32  ;;  %s1036_s26 = smov (!%p161_p3), 32  }
   0x8   : > { %s1037_s4 = smov (!%p161_p3), 2   ;;  %s1038_s9 = smov (!%p161_p3), 16  }
   0x9   : > { %p190_p4 = scmp.lt.s32.totalorder (!%p161_p3), %s1024_s12, 1  ;;  %s1041_s25 = smov (!%p161_p3), 111  }
   0xa   : > { %s1044_s28 = smov (!%p161_p3), 96   ;;  %s1045_s29 = smov (!%p161_p3), 94  }
   0xb   : > { %s1047_s6 = smov (!%p161_p3), 112  }
   0xc   : > { %v967_v0 = vld [vmem:[%s1388_s2 + $0x1] ss:$2 sm:$0x3]  ;;  %v562_v2 = vld [vmem:[%s1388_s2] ss:$2 sm:$0x3]  ;;  %v213_v42 = vlaneseq }
   0xd   : > { %719 = vrot.lane.b32.xlu1 %v967_v0, %s1034_s18  ;;  %v963_v1 = vld [vmem:[%s1388_s2 + $0x1] ss:$2 sm:$0x3]  ;;  %v689_v3 = vld [vmem:[%s1388_s2] ss:$2 sm:$0x3] }
   0xe   : > { %673 = vrot.lane.b32.xlu0 %v963_v1, %s1035_s21  ;;  %v959_v4 = vld [vmem:[%s1388_s2 + $0x1] ss:$2 sm:$0x3]  ;;  %v643_v7 = vld [vmem:[%s1388_s2] ss:$2 sm:$0x3] }
   0xf   : > { %v955_v5 = vld [vmem:[%s1388_s2 + $0x1] ss:$2 sm:$0x3]  ;;  %v516_v8 = vld [vmem:[%s1388_s2] ss:$2 sm:$0x3] }
  0x10   : > { %v943_v6 = vld [vmem:[%s1388_s2 + $0x1] ss:$2 sm:$0x3]  ;;  %v389_v12 = vld [vmem:[%s1388_s2] ss:$2 sm:$0x3] }
  0x11   : > { %564 = vrot.lane.b32.xlu1 %v562_v2, %s1036_s26  ;;  %v947_v9 = vld [vmem:[%s1388_s2 + $0x1] ss:$2 sm:$0x3]  ;;  %v435_v14 = vld [vmem:[%s1388_s2] ss:$2 sm:$0x3] }
  0x12   : > { %691 = vrot.lane.b32.xlu0 %v689_v3, %s1036_s26  ;;  %v931_v10 = vld [vmem:[%s1388_s2 + $0x1] ss:$2 sm:$0x3]  ;;  %s1397_s12 = smov (!%p190_p4, %s1024_s12), 1  ;;  %vm288_vm0 = vcmask 146432   ;;  %vm308_vm1 = vcmask 261120  }
  0x13   : > { %v951_v11 = vld [vmem:[%s1388_s2 + $0x1] ss:$2 sm:$0x3]  ;;  %v252_v16 = vld [vmem:[%s1388_s2] ss:$2 sm:$0x3] }
  0x14   : > { %v935_v13 = vld [vmem:[%s1388_s2 + $0x1] ss:$2 sm:$0x3]  ;;  %s971_s11 = smul.u32 12, %s1397_s12  ;;  %v1042_v43 = vmov 0.0   ;;  %vm339_vm2 = vcmask 277504  }
  0x15   : > { %627 = vrot.lane.b32.xlu1 %v959_v4, %s1037_s4  ;;  %v939_v15 = vld [vmem:[%s1388_s2 + $0x1] ss:$2 sm:$0x3]  ;;  %v303_v18 = vld [vmem:[%s1388_s2] ss:$2 sm:$0x3]  ;;  %815 = vmatprep.mubr.f32.mxu0 %v1042_v43 }
  0x16   : > { %592 = vrot.lane.b32.xlu0 %v955_v5, %s1034_s18  ;;  %v929_v17 = vld [vmem:[%s1388_s2 + $0x1] ss:$2 sm:$0x3]  ;;  %s1166_s24 = scalar_lea.vmem %s1386_s0, %s971_s11  ;;  %735 = vst [vmem:[#allocation2 + $0x48] sm:$0xf0] %v1042_v43  ;;  %vm1196_vm3 = vcmp.lt.s32.totalorder %v213_v42, 256 }
  0x17   : > { %v930_v19 = vld [vmem:[%s1388_s2 + $0x1] ss:$2 sm:$0x3]  ;;  %v953_v20 = vld [vmem:[%s1166_s24 + $0x2] ss:$4 sm:$0x7] }
  0x18   : > { %v965_v21 = vld [vmem:[%s1166_s24 + $0x3] ss:$4 sm:$0x7]  ;;  %v941_v24 = vld [vmem:[%s1166_s24 + $0x1] ss:$4 sm:$0x7] }
  0x19   : > { %465 = vrot.lane.b32.xlu1 %v943_v6, %s1034_s18  ;;  %v957_v22 = vld [vmem:[%s1166_s24 + $0x3] ss:$4 sm:$0x7]  ;;  %v949_v25 = vld [vmem:[%s1166_s24 + $0x2] ss:$4 sm:$0x7] }
  0x1a   : > { %645 = vrot.lane.b32.xlu0 %v643_v7, %s1038_s9  ;;  %v961_v23 = vld [vmem:[%s1166_s24 + $0x3] ss:$4 sm:$0x7]  ;;  %v945_v26 = vld [vmem:[%s1166_s24 + $0x2] ss:$4 sm:$0x7] }
  0x1b   : > { %v937_v27 = vld [vmem:[%s1166_s24 + $0x1] ss:$4 sm:$0x7]  ;;  %v271_v29 = vld [vmem:[%s1166_s24] ss:$4 sm:$0x7] }
  0x1c   : > { %v933_v28 = vld [vmem:[%s1166_s24 + $0x1] ss:$4 sm:$0x7]  ;;  %v219_v30 = vld [vmem:[%s1166_s24] ss:$4 sm:$0x7] }
  0x1d   : > { %518 = vrot.lane.b32.xlu1 %v516_v8, %s1038_s9  ;;  %v962_v33 = vld [vmem:[%s1166_s24 + $0x3] ss:$4 sm:$0x7]  ;;  %v952_v37 = vld [vmem:[%s1166_s24 + $0x2] ss:$4 sm:$0x7] }
  0x1e   : > { %500 = vrot.lane.b32.xlu0 %v947_v9, %s1037_s4  ;;  %v964_v41 = vld [vmem:[%s1166_s24 + $0x3] ss:$4 sm:$0x7]  ;;  %734 = vst [vmem:[#allocation2 + $0x40] sm:$0xf0] %v1042_v43  ;;  %vm237_vm4 = vcmask 15360  }
  0x1f   : > { %v956_v46 = vld [vmem:[%s1166_s24 + $0x3] ss:$4 sm:$0x3]  ;;  %v609_v48 = vld [vmem:[%s1388_s2] ss:$2 sm:$0x3] }
  0x20   : > { %v610_v52 = vmul.f32 %v956_v46, %v609_v48  ;;  %v966_v53 = vld [vmem:[%s1166_s24 + $0x3] ss:$4 sm:$0x7]  ;;  %v954_v58 = vld [vmem:[%s1166_s24 + $0x2] ss:$4 sm:$0x7] }
  0x21   : > { %336 = vrot.lane.b32.xlu1 %v931_v10, %s1034_s18  ;;  %vm257_vm5 = vcmask 130048   ;;  %v958_v1 = vld [vmem:[%s1166_s24 + $0x3] ss:$4 sm:$0x7]  ;;  %s1046_s18 = smov 126   ;;  %vm327_vm6 = vcmask 777216  }
  0x22   : > { %546 = vrot.lane.b32.xlu0 %v951_v11, %s1035_s21  ;;  %612 = vst.msk [vmem:[#allocation2 + $0x33] ss:$8 sm:$0x3] %vm1196_vm3, %v610_v52  ;;  %v960_v3 = vld [vmem:[%s1166_s24 + $0x3] ss:$4 sm:$0x7] }
  0x23   : > { %v944_v7 = vld [vmem:[%s1166_s24 + $0x2] ss:$4 sm:$0x3]  ;;  %vm224_vm7 = vcmask 1039360   ;;  %vm276_vm8 = vcmask 908288   ;;  %vm296_vm9 = vcmask 900096  }
  0x24   : > { %v482_v8 = vld [vmem:[%s1388_s2] ss:$2 sm:$0x3]  ;;  %vm316_vm10 = vcmask 785408   ;;  %vm347_vm11 = vcmask 769024   ;;  %vm245_vm12 = vcmask 1031168  }
  0x25   : > { %391 = vrot.lane.b32.xlu1 %v389_v12, %s1038_s9  ;;  %v483_v11 = vmul.f32 %v944_v7, %v482_v8  ;;  %v355_v42 = vld [vmem:[%s1388_s2] ss:$2 sm:$0x3]  ;;  %vm265_vm13 = vcmask 916480   ;;  %vm747_vm14 = vcmask 326656   ;;  %s928_s19 = sshll.u32 %s1397_s12, 3 }
  0x26   : > { %373 = vrot.lane.b32.xlu0 %v935_v13, %s1037_s4  ;;  %v230_v7 = vld [vmem:[%s1166_s24] ss:$4 sm:$0x7]  ;;  %s205_s23 = scalar_lea.vmem %s1389_s3, %s928_s19  ;;  %vm825_vm15 = vcmask 7168  }
  0x27   : > { %485 = vst.msk [vmem:[#allocation2 + $0x22] ss:$8 sm:$0x3] %vm1196_vm3, %v483_v11 }
  0x29   : > { %437 = vrot.lane.b32.xlu1 %v435_v14, %s1036_s26 }
  0x2a   : > { %419 = vrot.lane.b32.xlu0 %v939_v15, %s1035_s21  ;;  %v948_v15 = vld [vmem:[%s1166_s24 + $0x2] ss:$4 sm:$0x7] }
  0x2d   : > { %254 = vrot.lane.b32.xlu1 %v252_v16, %s1038_s9  ;;  %s1040_s9 = smov 127  }
  0x2e   : > { %234 = vrot.lane.b32.xlu0 %v929_v17, %s1037_s4  ;;  %s1039_s4 = smov 95   ;;  %v942_v17 = vld [vmem:[%s1166_s24 + $0x1] ss:$4 sm:$0x7] }
  0x31   : > { %305 = vrot.lane.b32.xlu1 %v303_v18, %s1036_s26 }
  0x32   : > { %285 = vrot.lane.b32.xlu0 %v930_v19, %s1035_s21  ;;  %s1043_s21 = smov 110  }
  0x35   : > { %581 = vrot.lane.b32.xlu1 %v953_v20, %s1039_s4 }
  0x36   : > { %708 = vrot.lane.b32.xlu0 %v965_v21, %s1039_s4 }
  0x39   : > { %616 = vrot.lane.b32.xlu1 %v957_v22, %s1040_s9 }
  0x3a   : > { %662 = vrot.lane.b32.xlu0 %v961_v23, %s1041_s25 }
  0x3d   : > { %454 = vrot.lane.b32.xlu1 %v941_v24, %s1039_s4  ;;  %v946_v24 = vld [vmem:[%s1166_s24 + $0x2] ss:$4 sm:$0x7] }
  0x3e   : > { %535 = vrot.lane.b32.xlu0 %v949_v25, %s1041_s25 }
  0x41   : > { %489 = vrot.lane.b32.xlu1 %v945_v26, %s1040_s9 }
  0x42   : > { %408 = vrot.lane.b32.xlu0 %v937_v27, %s1041_s25  ;;  %v950_v27 = vld [vmem:[%s1166_s24 + $0x2] ss:$4 sm:$0x7] }
  0x45   : > { %362 = vrot.lane.b32.xlu1 %v933_v28, %s1040_s9 }
  0x46   : > { %273 = vrot.lane.b32.xlu0 %v271_v29, %s1041_s25 }
  0x49   : > { %221 = vrot.lane.b32.xlu1 %v219_v30, %s1040_s9 }
  0x7f   : > { %v720_v31 = vpop.permute.xlu1 %719 }
  0x80   : > { %v674_v32 = vpop.permute.xlu0 %673  ;;  %v721_v44 = vrot.slane %v720_v31, 7 }
  0x81   : > { %v675_v34 = vrot.slane %v674_v32, 7 }
  0x82   : > { %v722_v57 = vsel %vm339_vm2, %v721_v44, %v720_v31  ;;  %v333_v31 = vld [vmem:[%s1166_s24] ss:$4 sm:$0x7] }
  0x83   : > { %v676_v35 = vsel %vm288_vm0, %v675_v34, %v674_v32  ;;  %v565_v36 = vpop.permute.xlu1 %564  ;;  %v724_v63 = vmul.f32 %v966_v53, %v722_v57 }
  0x84   : > { %v678_v38 = vmul.f32 %v962_v33, %v676_v35  ;;  %v566_v39 = vrot.slane %v565_v36, 7  ;;  %v692_v40 = vpop.permute.xlu0 %691 }
  0x85   : > { %v693_v45 = vrot.slane %v692_v40, 7 }
  0x86   : > { %v567_v47 = vsel %vm308_vm1, %v566_v39, %v565_v36  ;;  %680 = vrot.lane.b32.xlu0 %v678_v38, %s1043_s21  ;;  %v936_v36 = vld [vmem:[%s1166_s24 + $0x1] ss:$4 sm:$0x7] }
  0x87   : > { %v569_v49 = vmul.f32 %v952_v37, %v567_v47  ;;  %v694_v50 = vsel %vm308_vm1, %v693_v45, %v692_v40  ;;  %v628_v51 = vpop.permute.xlu1 %627  ;;  %v932_v40 = vld [vmem:[%s1166_s24 + $0x1] ss:$4 sm:$0x3] }
  0x88   : > { %v696_v54 = vmul.f32 %v964_v41, %v694_v50  ;;  %v593_v55 = vpop.permute.xlu0 %592  ;;  %v629_v60 = vrot.slane %v628_v51, 7  ;;  %v356_v45 = vmul.f32 %v932_v40, %v355_v42  ;;  %v934_v47 = vld [vmem:[%s1166_s24 + $0x1] ss:$4 sm:$0x7] }
  0x89   : > { %v594_v59 = vrot.slane %v593_v55, 7  ;;  %v938_v50 = vld [vmem:[%s1166_s24 + $0x1] ss:$4 sm:$0x7] }
  0x8a   : > { %571 = vrot.lane.b32.xlu0 %v569_v49, %s1044_s28  ;;  %698 = vrot.lane.b32.xlu1 %v696_v54, %s1044_s28  ;;  %v630_v4 = vsel %vm237_vm4, %v629_v60, %v628_v51  ;;  %358 = vst.msk [vmem:[#allocation2 + $0x11] ss:$8 sm:$0x3] %vm1196_vm3, %v356_v45  ;;  %v940_v54 = vld [vmem:[%s1166_s24 + $0x1] ss:$4 sm:$0x7] }
  0x8b   : > { %v595_v61 = vsel %vm339_vm2, %v594_v59, %v593_v55  ;;  %v466_v62 = vpop.permute.xlu1 %465  ;;  %v632_v12 = vmul.f32 %v958_v1, %v630_v4  ;;  %v251_v59 = vld [vmem:[%s1166_s24] ss:$4 sm:$0x7] }
  0x8c   : > { %v597_v0 = vmul.f32 %v954_v58, %v595_v61  ;;  %v646_v2 = vpop.permute.xlu0 %645  ;;  %v467_v6 = vrot.slane %v466_v62, 7 }
  0x8d   : > { %v647_v5 = vrot.slane %v646_v2, 7 }
  0x8e   : > { %599 = vrot.lane.b32.xlu0 %v597_v0, %s1045_s29  ;;  %726 = vrot.lane.b32.xlu1 %v724_v63, %s1045_s29  ;;  %v468_v18 = vsel %vm339_vm2, %v467_v6, %v466_v62  ;;  %v210_v0 = vld [vmem:[%s1166_s24] ss:$4 sm:$0x3] }
  0x8f   : > { %v648_v9 = vsel %vm257_vm5, %v647_v5, %v646_v2  ;;  %v519_v10 = vpop.permute.xlu1 %518  ;;  %v470_v23 = vmul.f32 %v942_v17, %v468_v18  ;;  %v211_v2 = vld [vmem:[%s1388_s2] ss:$2 sm:$0x3] }
  0x90   : > { %v650_v13 = vmul.f32 %v960_v3, %v648_v9  ;;  %v501_v14 = vpop.permute.xlu0 %500  ;;  %v520_v16 = vrot.slane %v519_v10, 7  ;;  %v212_v5 = vmul.f32 %v211_v2, %v210_v0 }
  0x91   : > { %v502_v19 = vrot.slane %v501_v14, 7 }
  0x92   : > { %v521_v20 = vsel %vm257_vm5, %v520_v16, %v519_v10  ;;  %634 = vrot.lane.b32.xlu0 %v632_v12, %s1046_s18  ;;  %652 = vrot.lane.b32.xlu1 %v650_v13, %s1047_s6  ;;  %v282_v10 = vld [vmem:[%s1166_s24] ss:$4 sm:$0x7]  ;;  %217 = vst.msk [vmem:[#allocation2] ss:$8 sm:$0x3] %vm1196_vm3, %v212_v5 }
  0x93   : > { %v523_v21 = vmul.f32 %v948_v15, %v521_v20  ;;  %v337_v22 = vpop.permute.xlu1 %336  ;;  %v503_v26 = vsel %vm237_vm4, %v502_v19, %v501_v14  ;;  %v302_v19 = vld [vmem:[%s1166_s24] ss:$4 sm:$0x7] }
  0x94   : > { %v547_v25 = vpop.permute.xlu0 %546  ;;  %v338_v29 = vrot.slane %v337_v22, 7  ;;  %v505_v33 = vmul.f32 %v946_v24, %v503_v26 }
  0x95   : > { %v548_v28 = vrot.slane %v547_v25, 7 }
  0x96   : > { %472 = vrot.lane.b32.xlu0 %v470_v23, %s1045_s29  ;;  %525 = vrot.lane.b32.xlu1 %v523_v21, %s1047_s6  ;;  %v340_v38 = vsel %vm339_vm2, %v338_v29, %v337_v22  ;;  %v322_v23 = vld [vmem:[%s1166_s24] ss:$4 sm:$0x7] }
  0x97   : > { %v549_v30 = vsel %vm288_vm0, %v548_v28, %v547_v25  ;;  %v392_v32 = vpop.permute.xlu1 %391  ;;  %v342_v46 = vmul.f32 %v340_v38, %v333_v31 }
  0x98   : > { %v551_v34 = vmul.f32 %v950_v27, %v549_v30  ;;  %v374_v35 = vpop.permute.xlu0 %373  ;;  %v393_v37 = vrot.slane %v392_v32, 7 }
  0x99   : > { %v375_v39 = vrot.slane %v374_v35, 7 }
  0x9a   : > { %v394_v41 = vsel %vm257_vm5, %v393_v37, %v392_v32  ;;  %507 = vrot.lane.b32.xlu0 %v505_v33, %s1046_s18  ;;  %553 = vrot.lane.b32.xlu1 %v551_v34, %s1043_s21 }
  0x9b   : > { %v396_v43 = vmul.f32 %v936_v36, %v394_v41  ;;  %v438_v44 = vpop.permute.xlu1 %437  ;;  %v376_v49 = vsel %vm237_vm4, %v375_v39, %v374_v35 }
  0x9c   : > { %v420_v48 = vpop.permute.xlu0 %419  ;;  %v439_v52 = vrot.slane %v438_v44, 7  ;;  %v378_v57 = vmul.f32 %v934_v47, %v376_v49 }
  0x9d   : > { %v421_v51 = vrot.slane %v420_v48, 7 }
  0x9e   : > { %344 = vrot.lane.b32.xlu0 %v342_v46, %s1045_s29  ;;  %398 = vrot.lane.b32.xlu1 %v396_v43, %s1047_s6  ;;  %v440_v62 = vsel %vm308_vm1, %v439_v52, %v438_v44 }
  0x9f   : > { %v422_v53 = vsel %vm288_vm0, %v421_v51, %v420_v48  ;;  %v255_v55 = vpop.permute.xlu1 %254  ;;  %v442_v6 = vmul.f32 %v940_v54, %v440_v62 }
  0xa0   : > { %v424_v58 = vmul.f32 %v938_v50, %v422_v53  ;;  %v256_v60 = vrot.slane %v255_v55, 7  ;;  %v235_v61 = vpop.permute.xlu0 %234 }
  0xa1   : > { %v236_v63 = vrot.slane %v235_v61, 7 }
  0xa2   : > { %v258_v1 = vsel %vm257_vm5, %v256_v60, %v255_v55  ;;  %380 = vrot.lane.b32.xlu0 %v378_v57, %s1046_s18  ;;  %426 = vrot.lane.b32.xlu1 %v424_v58, %s1043_s21 }
  0xa3   : > { %v260_v3 = vmul.f32 %v258_v1, %v251_v59  ;;  %v306_v4 = vpop.permute.xlu1 %305  ;;  %v238_v9 = vsel %vm237_vm4, %v236_v63, %v235_v61 }
  0xa4   : > { %v286_v8 = vpop.permute.xlu0 %285  ;;  %v307_v12 = vrot.slane %v306_v4, 7  ;;  %v240_v15 = vmul.f32 %v238_v9, %v230_v7 }
  0xa5   : > { %v287_v11 = vrot.slane %v286_v8, 7 }
  0xa6   : > { %444 = vrot.lane.b32.xlu0 %v442_v6, %s1044_s28  ;;  %262 = vrot.lane.b32.xlu1 %v260_v3, %s1047_s6  ;;  %v309_v20 = vsel %vm308_vm1, %v307_v12, %v306_v4 }
  0xa7   : > { %v289_v13 = vsel %vm288_vm0, %v287_v11, %v286_v8  ;;  %v582_v14 = vpop.permute.xlu1 %581  ;;  %v311_v26 = vmul.f32 %v309_v20, %v302_v19  ;;  %vm832_vm0 = vcmask 15368  }
  0xa8   : > { %v291_v16 = vmul.f32 %v289_v13, %v282_v10  ;;  %v709_v17 = vpop.permute.xlu0 %708  ;;  %v583_v18 = vrot.slane %v582_v14, 1 }
  0xa9   : > { %v710_v21 = vrot.slane %v709_v17, 1 }
  0xaa   : > { %242 = vrot.lane.b32.xlu0 %v240_v15, %s1046_s18  ;;  %293 = vrot.lane.b32.xlu1 %v291_v16, %s1043_s21  ;;  %v584_v22 = vsel %vm327_vm6, %v582_v14, %v583_v18 }
  0xab   : > { %v711_v24 = vsel %vm327_vm6, %v709_v17, %v710_v21  ;;  %587 = vst.msk [vmem:[#allocation2 + $0x31] ss:$8 sm:$0x3] %vm1196_vm3, %v584_v22  ;;  %v617_v25 = vpop.permute.xlu1 %616 }
  0xac   : > { %714 = vst.msk [vmem:[#allocation2 + $0x42] ss:$8 sm:$0x3] %vm1196_vm3, %v711_v24  ;;  %v663_v27 = vpop.permute.xlu0 %662  ;;  %v618_v28 = vrot.slane %v617_v25, 1 }
  0xad   : > { %v664_v29 = vrot.slane %v663_v27, 1 }
  0xae   : > { %313 = vrot.lane.b32.xlu0 %v311_v26, %s1044_s28  ;;  %324 = vrot.lane.b32.xlu1 %v322_v23, %s1039_s4  ;;  %v619_v30 = vsel %vm224_vm7, %v617_v25, %v618_v28 }
  0xaf   : > { %v665_v31 = vsel %vm276_vm8, %v663_v27, %v664_v29  ;;  %622 = vst.msk [vmem:[#allocation2 + $0x34] ss:$8 sm:$0x3] %vm1196_vm3, %v619_v30  ;;  %v455_v32 = vpop.permute.xlu1 %454 }
  0xb0   : > { %668 = vst.msk [vmem:[#allocation2 + $0x37] ss:$8 sm:$0x3] %vm1196_vm3, %v665_v31  ;;  %v536_v33 = vpop.permute.xlu0 %535  ;;  %v456_v34 = vrot.slane %v455_v32, 1 }
  0xb1   : > { %v537_v35 = vrot.slane %v536_v33, 1 }
  0xb2   : > { %v457_v36 = vsel %vm327_vm6, %v455_v32, %v456_v34 }
  0xb3   : > { %v538_v37 = vsel %vm276_vm8, %v536_v33, %v537_v35  ;;  %460 = vst.msk [vmem:[#allocation2 + $0x20] ss:$8 sm:$0x3] %vm1196_vm3, %v457_v36  ;;  %v490_v38 = vpop.permute.xlu1 %489 }
  0xb4   : > { %541 = vst.msk [vmem:[#allocation2 + $0x26] ss:$8 sm:$0x3] %vm1196_vm3, %v538_v37  ;;  %v491_v39 = vrot.slane %v490_v38, 1  ;;  %v409_v40 = vpop.permute.xlu0 %408 }
  0xb5   : > { %v410_v41 = vrot.slane %v409_v40, 1 }
  0xb6   : > { %v492_v42 = vsel %vm224_vm7, %v490_v38, %v491_v39 }
  0xb7   : > { %495 = vst.msk [vmem:[#allocation2 + $0x23] ss:$8 sm:$0x3] %vm1196_vm3, %v492_v42  ;;  %v411_v43 = vsel %vm276_vm8, %v409_v40, %v410_v41  ;;  %v363_v44 = vpop.permute.xlu1 %362 }
  0xb8   : > { %414 = vst.msk [vmem:[#allocation2 + $0x15] ss:$8 sm:$0x3] %vm1196_vm3, %v411_v43  ;;  %v364_v45 = vrot.slane %v363_v44, 1  ;;  %v274_v46 = vpop.permute.xlu0 %273 }
  0xb9   : > { %v275_v47 = vrot.slane %v274_v46, 1 }
  0xba   : > { %v365_v48 = vsel %vm224_vm7, %v363_v44, %v364_v45 }
  0xbb   : > { %368 = vst.msk [vmem:[#allocation2 + $0x12] ss:$8 sm:$0x3] %vm1196_vm3, %v365_v48  ;;  %v277_v49 = vsel %vm276_vm8, %v274_v46, %v275_v47  ;;  %v222_v50 = vpop.permute.xlu1 %221 }
  0xbc   : > { %280 = vst.msk [vmem:[#allocation2 + $0x4] ss:$8 sm:$0x3] %vm1196_vm3, %v277_v49  ;;  %v223_v51 = vrot.slane %v222_v50, 1 }
  0xbe   : > { %v225_v52 = vsel %vm224_vm7, %v222_v50, %v223_v51 }
  0xbf   : > { %228 = vst.msk [vmem:[#allocation2 + $0x1] ss:$8 sm:$0x3] %vm1196_vm3, %v225_v52 }
  0xf8   : > { %v681_v53 = vpop.permute.xlu0 %680 }
  0xf9   : > { %v682_v54 = vrot.slane %v681_v53, 1 }
  0xfb   : > { %v683_v55 = vsel %vm296_vm9, %v681_v53, %v682_v54 }
  0xfc   : > { %686 = vst.msk [vmem:[#allocation2 + $0x40] ss:$8 sm:$0x3] %vm1196_vm3, %v683_v55  ;;  %v572_v57 = vpop.permute.xlu0 %571  ;;  %v699_v58 = vpop.permute.xlu1 %698 }
  0xfd   : > { %v573_v59 = vrot.slane %v572_v57, 1  ;;  %v700_v60 = vrot.slane %v699_v58, 1 }
  0xff   : > { %v574_v61 = vsel %vm316_vm10, %v572_v57, %v573_v59  ;;  %v701_v62 = vsel %vm316_vm10, %v699_v58, %v700_v60 }
 0x100   : > { %577 = vst.msk [vmem:[#allocation2 + $0x30] ss:$8 sm:$0x3] %vm1196_vm3, %v574_v61  ;;  %704 = vst.msk [vmem:[#allocation2 + $0x41] ss:$8 sm:$0x3] %vm1196_vm3, %v701_v62  ;;  %v600_v63 = vpop.permute.xlu0 %599  ;;  %v727_v0 = vpop.permute.xlu1 %726 }
 0x101   : > { %v601_v1 = vrot.slane %v600_v63, 1  ;;  %v728_v2 = vrot.slane %v727_v0, 1 }
 0x103   : > { %v602_v3 = vsel %vm347_vm11, %v600_v63, %v601_v1  ;;  %v729_v4 = vsel %vm347_vm11, %v727_v0, %v728_v2  ;;  %v736_v0 = vld [vmem:[%s1387_s1] sm:$0xff] }
 0x104   : > { %605 = vst.msk [vmem:[#allocation2 + $0x32] ss:$8 sm:$0x3] %vm1196_vm3, %v602_v3  ;;  %732 = vst.msk [vmem:[#allocation2 + $0x43] ss:$8 sm:$0x3] %vm1196_vm3, %v729_v4  ;;  %v635_v5 = vpop.permute.xlu0 %634  ;;  %v653_v6 = vpop.permute.xlu1 %652 }
 0x105   : > { %v636_v7 = vrot.slane %v635_v5, 1  ;;  %v654_v8 = vrot.slane %v653_v6, 1 }
 0x107   : > { %v637_v9 = vsel %vm245_vm12, %v635_v5, %v636_v7  ;;  %v655_v10 = vsel %vm265_vm13, %v653_v6, %v654_v8 }
 0x108   : > { %640 = vst.msk [vmem:[#allocation2 + $0x35] ss:$8 sm:$0x3] %vm1196_vm3, %v637_v9  ;;  %658 = vst.msk [vmem:[#allocation2 + $0x36] ss:$8 sm:$0x3] %vm1196_vm3, %v655_v10  ;;  %v473_v11 = vpop.permute.xlu0 %472  ;;  %v526_v12 = vpop.permute.xlu1 %525 }
 0x109   : > { %v474_v13 = vrot.slane %v473_v11, 1  ;;  %v527_v14 = vrot.slane %v526_v12, 1 }
 0x10b   : > { %v475_v15 = vsel %vm347_vm11, %v473_v11, %v474_v13  ;;  %v528_v16 = vsel %vm265_vm13, %v526_v12, %v527_v14  ;;  %v746_v17 = vld [vmem:[#allocation2 + $0x48] sm:$0xff]  ;;  %v745_v18 = vld [vmem:[#allocation2 + $0x40] sm:$0xff] }
 0x10c   : > { %478 = vst.msk [vmem:[#allocation2 + $0x21] ss:$8 sm:$0x3] %vm1196_vm3, %v475_v15  ;;  %531 = vst.msk [vmem:[#allocation2 + $0x25] ss:$8 sm:$0x3] %vm1196_vm3, %v528_v16  ;;  %v508_v19 = vpop.permute.xlu0 %507  ;;  %773 = vmatprep.subr.mxu0 %v746_v17  ;;  %v554_v20 = vpop.permute.xlu1 %553 }
 0x10d   : > { %v509_v21 = vrot.slane %v508_v19, 1  ;;  %v555_v22 = vrot.slane %v554_v20, 1  ;;  %774 = vmatpush1.msra.mxu0 %v745_v18 }
 0x10f   : > { %v510_v23 = vsel %vm245_vm12, %v508_v19, %v509_v21  ;;  %v556_v24 = vsel %vm296_vm9, %v554_v20, %v555_v22  ;;  %v744_v25 = vld [vmem:[#allocation2 + $0x38] sm:$0xff]  ;;  %v743_v26 = vld [vmem:[#allocation2 + $0x30] sm:$0xff] }
 0x110   : > { %513 = vst.msk [vmem:[#allocation2 + $0x24] ss:$8 sm:$0x3] %vm1196_vm3, %v510_v23  ;;  %559 = vst.msk [vmem:[#allocation2 + $0x27] ss:$8 sm:$0x3] %vm1196_vm3, %v556_v24  ;;  %v345_v27 = vpop.permute.xlu0 %344  ;;  %775 = vmatprep.subr.mxu0 %v744_v25  ;;  %v399_v28 = vpop.permute.xlu1 %398 }
 0x111   : > { %v346_v29 = vrot.slane %v345_v27, 1  ;;  %v400_v30 = vrot.slane %v399_v28, 1  ;;  %776 = vmatpush1.msra.mxu0 %v743_v26 }
 0x113   : > { %v348_v31 = vsel %vm347_vm11, %v345_v27, %v346_v29  ;;  %v401_v32 = vsel %vm265_vm13, %v399_v28, %v400_v30 }
 0x114   : > { %351 = vst.msk [vmem:[#allocation2 + $0x10] ss:$8 sm:$0x3] %vm1196_vm3, %v348_v31  ;;  %404 = vst.msk [vmem:[#allocation2 + $0x14] ss:$8 sm:$0x3] %vm1196_vm3, %v401_v32  ;;  %v381_v33 = vpop.permute.xlu0 %380  ;;  %v427_v34 = vpop.permute.xlu1 %426 }
 0x115   : > { %v382_v35 = vrot.slane %v381_v33, 1  ;;  %v428_v36 = vrot.slane %v427_v34, 1 }
 0x117   : > { %v383_v37 = vsel %vm245_vm12, %v381_v33, %v382_v35  ;;  %v429_v38 = vsel %vm296_vm9, %v427_v34, %v428_v36  ;;  %v742_v39 = vld [vmem:[#allocation2 + $0x28] sm:$0xff]  ;;  %v741_v40 = vld [vmem:[#allocation2 + $0x20] sm:$0xff] }
 0x118   : > { %386 = vst.msk [vmem:[#allocation2 + $0x13] ss:$8 sm:$0x3] %vm1196_vm3, %v383_v37  ;;  %432 = vst.msk [vmem:[#allocation2 + $0x16] ss:$8 sm:$0x3] %vm1196_vm3, %v429_v38  ;;  %v445_v41 = vpop.permute.xlu0 %444  ;;  %777 = vmatprep.subr.mxu0 %v742_v39  ;;  %v263_v42 = vpop.permute.xlu1 %262 }
 0x119   : > { %v446_v43 = vrot.slane %v445_v41, 1  ;;  %v264_v44 = vrot.slane %v263_v42, 1  ;;  %778 = vmatpush1.msra.mxu0 %v741_v40 }
 0x11b   : > { %v447_v45 = vsel %vm316_vm10, %v445_v41, %v446_v43  ;;  %v266_v46 = vsel %vm265_vm13, %v263_v42, %v264_v44 }
 0x11c   : > { %450 = vst.msk [vmem:[#allocation2 + $0x17] ss:$8 sm:$0x3] %vm1196_vm3, %v447_v45  ;;  %269 = vst.msk [vmem:[#allocation2 + $0x3] ss:$8 sm:$0x3] %vm1196_vm3, %v266_v46  ;;  %v243_v47 = vpop.permute.xlu0 %242  ;;  %v294_v48 = vpop.permute.xlu1 %293 }
 0x11d   : > { %v244_v49 = vrot.slane %v243_v47, 1  ;;  %v295_v50 = vrot.slane %v294_v48, 1 }
 0x11f   : > { %v246_v51 = vsel %vm245_vm12, %v243_v47, %v244_v49  ;;  %v297_v52 = vsel %vm296_vm9, %v294_v48, %v295_v50 }
 0x120   : > { %249 = vst.msk [vmem:[#allocation2 + $0x2] ss:$8 sm:$0x3] %vm1196_vm3, %v246_v51  ;;  %300 = vst.msk [vmem:[#allocation2 + $0x5] ss:$8 sm:$0x3] %vm1196_vm3, %v297_v52  ;;  %v314_v53 = vpop.permute.xlu0 %313  ;;  %v325_v54 = vpop.permute.xlu1 %324 }
 0x121   : > { %v315_v55 = vrot.slane %v314_v53, 1  ;;  %v326_v57 = vrot.slane %v325_v54, 1 }
 0x123   : > { %v317_v58 = vsel %vm316_vm10, %v314_v53, %v315_v55  ;;  %v328_v59 = vsel %vm327_vm6, %v325_v54, %v326_v57  ;;  %v740_v60 = vld [vmem:[#allocation2 + $0x18] sm:$0xff]  ;;  %v739_v61 = vld [vmem:[#allocation2 + $0x10] sm:$0xff] }
 0x124   : > { %320 = vst.msk [vmem:[#allocation2 + $0x6] ss:$8 sm:$0x3] %vm1196_vm3, %v317_v58  ;;  %331 = vst.msk [vmem:[#allocation2 + $0x7] ss:$8 sm:$0x3] %vm1196_vm3, %v328_v59  ;;  %779 = vmatprep.subr.mxu0 %v740_v60 }
 0x125   : > { %780 = vmatpush1.msra.mxu0 %v739_v61 }
 0x12b   : > { %v738_v62 = vld [vmem:[#allocation2 + $0x8] sm:$0xff]  ;;  %v737_v63 = vld [vmem:[#allocation2] sm:$0xff] }
 0x12c   : > { %781 = vmatprep.subr.mxu0 %v738_v62 }
 0x12d   : > { %782 = vmatpush1.msra.mxu0 %v737_v63 }
 0x12e   : > { %968 = vmatmul.mubr.msk.f32.vlgmr.msra.gmra.mxu0 %vm747_vm14, %v736_v0 }
 0x1ee   : > { %v817_v1 = vpop.f32.mrf.mxu0 }
 0x1ef   : > { %v827_v3 = vmul.f32 %v817_v1, %v817_v1 }
 0x1f0   : > { %v819_v2 = vpop.f32.mrf.mxu0 }
 0x1f1   : > { %v822_v4 = vadd.f32 %v819_v2, %v817_v1  ;;  %v828_v5 = vmul.f32 %v819_v2, %v819_v2 }
 0x1f3   : > { %823 = vadd.xlane.f32.xlu0 %v822_v4  ;;  %v829_v56 = vadd.f32 %v828_v5, %v827_v3 }
 0x1f5   : > { %830 = vadd.xlane.f32.xlu1 %v829_v56 }
 0x27c   : > { %v824_v6 = vpop.xlane.xlu0 %823 }
 0x27d   : > { %826 = vst.msk [vmem:[%s205_s23] sm:$0xff] %vm825_vm15, %v824_v6 }
 0x27e   : > { %v831_v7 = vpop.xlane.xlu1 %830 }
 0x27f   : > { %833 = vst.msk [vmem:[%s205_s23] sm:$0xff] %vm832_vm0, %v831_v7 }
 0x280 PF: > { %s13_s14 = sadd.s32 1, %s1032_s14   ;;  %s1392_s12 = smov %s1028_s13 }
 0x281   : > { %p10_p5 = scmp.ge.s32.totalorder %s13_s14, 4   ;;  %s1393_s13 = smov %s1395_s15 }
 0x283   :  { %12 = sbr.rel (!%p10_p5) target bundleno = 2 (0x2), region = 108 }

// kernel: conv_bn_relu.3
= control target key start
LH: loop header
LB: loop body
LE: loop exit
PB: predicated region body
PF: predicated region fallthrough
CT: control target
= control target key end

     0   :  { %s1228_s18 = smov 0   ;;  %s1230_s19 = smov 0   ;;  %s1552_s0 = inlined_call_operand.vmem [shape: f32[2,4,290], index: 0, kind: input, shape index: {}]   ;;  %s1553_s1 = inlined_call_operand.vmem [shape: f32[8,40], index: 1, kind: input, shape index: {}]   ;;  %s1554_s2 = inlined_call_operand.vmem [shape: f32[2,256], index: 2, kind: input, shape index: {}]   ;;  %s1555_s3 = inlined_call_operand.vmem [shape: f32[8,1], index: 3, kind: input, shape index: {}]   ;;  %s1556_s4 = inlined_call_operand.vmem [shape: f32[8,1], index: 4, kind: input, shape index: {}]   ;;  %s1557_s5 = inlined_call_operand.vmem [shape: f32[2,8,256], index: 5, kind: output, shape index: {}]  }
   0x1   :  { %s1232_s20 = smov 0  }
   0x2 LB: > { %s27_s21 = sadd.s32 1, %s1177_s19  ;;  %p1070_p0 = scmp.ge.s32.totalorder %s1181_s20, 1  ;;  %s1181_s20 = sphi %s1232_s20, %s15_s20   ;;  %s1177_s19 = sphi %s1230_s19, %s1561_s19   ;;  %s1173_s18 = sphi %s1228_s18, %s1560_s18  }
   0x3   : > { %p29_p1 = scmp.ge.s32.totalorder %s27_s21, 2  ;;  %p228_p2 = scmp.lt.s32.totalorder %s1181_s20, 3 }
   0x5   : > { %s1563_s21 = smov (%p29_p1, %s27_s21), 0  ;;  %p229_p3 = pnand %p1070_p0, %p228_p2 }
   0x6   : > { %s1183_s24 = smov (!%p229_p3), 34   ;;  %s1184_s27 = smov (!%p229_p3), 18  }
   0x7   : > { %232 = sbr.rel (%p229_p3) target bundleno = 504 (0x1f8), region = 40  ;;  %s1185_s7 = smov (!%p229_p3), 32  }
   0x8   : > { %s1186_s12 = smov (!%p229_p3), 2   ;;  %s1187_s17 = smov (!%p229_p3), 16  }
   0x9   : > { %p272_p4 = scmp.lt.s32.totalorder (!%p229_p3), %s1173_s18, 1  ;;  %s1190_s11 = smov (!%p229_p3), 111  }
   0xa   : > { %s1193_s14 = smov (!%p229_p3), 96   ;;  %s1194_s15 = smov (!%p229_p3), 94  }
   0xb   : > { %s1195_s22 = smov (!%p229_p3), 126   ;;  %s1196_s23 = smov (!%p229_p3), 112  }
   0xc   : > { %v1112_v0 = vld [vmem:[%s1554_s2 + $0x1] ss:$2 sm:$0x3]  ;;  %v654_v2 = vld [vmem:[%s1554_s2] ss:$2 sm:$0x3]  ;;  %v305_v42 = vlaneseq }
   0xd   : > { %811 = vrot.lane.b32.xlu1 %v1112_v0, %s1183_s24  ;;  %v1108_v1 = vld [vmem:[%s1554_s2 + $0x1] ss:$2 sm:$0x3]  ;;  %v781_v3 = vld [vmem:[%s1554_s2] ss:$2 sm:$0x3] }
   0xe   : > { %765 = vrot.lane.b32.xlu0 %v1108_v1, %s1184_s27  ;;  %v1104_v4 = vld [vmem:[%s1554_s2 + $0x1] ss:$2 sm:$0x3]  ;;  %v735_v7 = vld [vmem:[%s1554_s2] ss:$2 sm:$0x3] }
   0xf   : > { %v1100_v5 = vld [vmem:[%s1554_s2 + $0x1] ss:$2 sm:$0x3]  ;;  %v608_v8 = vld [vmem:[%s1554_s2] ss:$2 sm:$0x3] }
  0x10   : > { %v1088_v6 = vld [vmem:[%s1554_s2 + $0x1] ss:$2 sm:$0x3]  ;;  %v481_v12 = vld [vmem:[%s1554_s2] ss:$2 sm:$0x3] }
  0x11   : > { %656 = vrot.lane.b32.xlu1 %v654_v2, %s1185_s7  ;;  %v1092_v9 = vld [vmem:[%s1554_s2 + $0x1] ss:$2 sm:$0x3]  ;;  %v527_v14 = vld [vmem:[%s1554_s2] ss:$2 sm:$0x3] }
  0x12   : > { %783 = vrot.lane.b32.xlu0 %v781_v3, %s1185_s7  ;;  %v1076_v10 = vld [vmem:[%s1554_s2 + $0x1] ss:$2 sm:$0x3]  ;;  %s1565_s18 = smov (!%p272_p4, %s1173_s18), 1  ;;  %vm380_vm0 = vcmask 146432   ;;  %vm400_vm1 = vcmask 261120  }
  0x13   : > { %v1096_v11 = vld [vmem:[%s1554_s2 + $0x1] ss:$2 sm:$0x3]  ;;  %v344_v16 = vld [vmem:[%s1554_s2] ss:$2 sm:$0x3] }
  0x14   : > { %v1080_v13 = vld [vmem:[%s1554_s2 + $0x1] ss:$2 sm:$0x3]  ;;  %s1117_s26 = smul.u32 12, %s1565_s18  ;;  %v1191_v43 = vmov 0.0   ;;  %vm431_vm2 = vcmask 277504  }
  0x15   : > { %719 = vrot.lane.b32.xlu1 %v1104_v4, %s1186_s12  ;;  %v1084_v15 = vld [vmem:[%s1554_s2 + $0x1] ss:$2 sm:$0x3]  ;;  %v395_v18 = vld [vmem:[%s1554_s2] ss:$2 sm:$0x3]  ;;  %907 = vmatprep.mubr.f32.mxu0 %v1191_v43 }
  0x16   : > { %684 = vrot.lane.b32.xlu0 %v1100_v5, %s1183_s24  ;;  %v1074_v17 = vld [vmem:[%s1554_s2 + $0x1] ss:$2 sm:$0x3]  ;;  %s1326_s10 = scalar_lea.vmem %s1552_s0, %s1117_s26  ;;  %827 = vst [vmem:[#allocation2 + $0x48] sm:$0xf0] %v1191_v43  ;;  %vm1356_vm3 = vcmp.lt.s32.totalorder %v305_v42, 256 }
  0x17   : > { %v1075_v19 = vld [vmem:[%s1554_s2 + $0x1] ss:$2 sm:$0x3]  ;;  %v1098_v20 = vld [vmem:[%s1326_s10 + $0x2] ss:$4 sm:$0x7] }
  0x18   : > { %v1110_v21 = vld [vmem:[%s1326_s10 + $0x3] ss:$4 sm:$0x7]  ;;  %v1086_v24 = vld [vmem:[%s1326_s10 + $0x1] ss:$4 sm:$0x7] }
  0x19   : > { %557 = vrot.lane.b32.xlu1 %v1088_v6, %s1183_s24  ;;  %v1102_v22 = vld [vmem:[%s1326_s10 + $0x3] ss:$4 sm:$0x7]  ;;  %v1094_v25 = vld [vmem:[%s1326_s10 + $0x2] ss:$4 sm:$0x7] }
  0x1a   : > { %737 = vrot.lane.b32.xlu0 %v735_v7, %s1187_s17  ;;  %v1106_v23 = vld [vmem:[%s1326_s10 + $0x3] ss:$4 sm:$0x7]  ;;  %v1090_v26 = vld [vmem:[%s1326_s10 + $0x2] ss:$4 sm:$0x7] }
  0x1b   : > { %v1082_v27 = vld [vmem:[%s1326_s10 + $0x1] ss:$4 sm:$0x7]  ;;  %v363_v29 = vld [vmem:[%s1326_s10] ss:$4 sm:$0x7] }
  0x1c   : > { %v1078_v28 = vld [vmem:[%s1326_s10 + $0x1] ss:$4 sm:$0x7]  ;;  %v311_v30 = vld [vmem:[%s1326_s10] ss:$4 sm:$0x7] }
  0x1d   : > { %610 = vrot.lane.b32.xlu1 %v608_v8, %s1187_s17  ;;  %v1107_v33 = vld [vmem:[%s1326_s10 + $0x3] ss:$4 sm:$0x7]  ;;  %v1097_v37 = vld [vmem:[%s1326_s10 + $0x2] ss:$4 sm:$0x7] }
  0x1e   : > { %592 = vrot.lane.b32.xlu0 %v1092_v9, %s1186_s12  ;;  %v1109_v41 = vld [vmem:[%s1326_s10 + $0x3] ss:$4 sm:$0x7]  ;;  %826 = vst [vmem:[#allocation2 + $0x40] sm:$0xf0] %v1191_v43  ;;  %vm329_vm4 = vcmask 15360  }
  0x1f   : > { %v1101_v46 = vld [vmem:[%s1326_s10 + $0x3] ss:$4 sm:$0x3]  ;;  %v701_v48 = vld [vmem:[%s1554_s2] ss:$2 sm:$0x3] }
  0x20   : > { %v702_v52 = vmul.f32 %v1101_v46, %v701_v48  ;;  %v1111_v53 = vld [vmem:[%s1326_s10 + $0x3] ss:$4 sm:$0x7]  ;;  %v1099_v58 = vld [vmem:[%s1326_s10 + $0x2] ss:$4 sm:$0x7] }
  0x21   : > { %428 = vrot.lane.b32.xlu1 %v1076_v10, %s1183_s24  ;;  %vm349_vm5 = vcmask 130048   ;;  %v1103_v1 = vld [vmem:[%s1326_s10 + $0x3] ss:$4 sm:$0x7]  ;;  %vm419_vm6 = vcmask 777216   ;;  %vm316_vm7 = vcmask 1039360  }
  0x22   : > { %638 = vrot.lane.b32.xlu0 %v1096_v11, %s1184_s27  ;;  %704 = vst.msk [vmem:[#allocation2 + $0x33] ss:$8 sm:$0x3] %vm1356_vm3, %v702_v52  ;;  %v1105_v3 = vld [vmem:[%s1326_s10 + $0x3] ss:$4 sm:$0x7] }
  0x23   : > { %v1089_v7 = vld [vmem:[%s1326_s10 + $0x2] ss:$4 sm:$0x3]  ;;  %vm368_vm8 = vcmask 908288   ;;  %vm388_vm9 = vcmask 900096   ;;  %vm408_vm10 = vcmask 785408  }
  0x24   : > { %v574_v8 = vld [vmem:[%s1554_s2] ss:$2 sm:$0x3]  ;;  %vm439_vm11 = vcmask 769024   ;;  %vm337_vm12 = vcmask 1031168   ;;  %vm357_vm13 = vcmask 916480  }
  0x25   : > { %483 = vrot.lane.b32.xlu1 %v481_v12, %s1187_s17  ;;  %v575_v11 = vmul.f32 %v1089_v7, %v574_v8  ;;  %v447_v42 = vld [vmem:[%s1554_s2] ss:$2 sm:$0x3]  ;;  %vm839_vm14 = vcmask 326656  }
  0x26   : > { %465 = vrot.lane.b32.xlu0 %v1080_v13, %s1186_s12  ;;  %v322_v7 = vld [vmem:[%s1326_s10] ss:$4 sm:$0x7] }
  0x27   : > { %577 = vst.msk [vmem:[#allocation2 + $0x22] ss:$8 sm:$0x3] %vm1356_vm3, %v575_v11 }
  0x29   : > { %529 = vrot.lane.b32.xlu1 %v527_v14, %s1185_s7 }
  0x2a   : > { %511 = vrot.lane.b32.xlu0 %v1084_v15, %s1184_s27  ;;  %v1093_v15 = vld [vmem:[%s1326_s10 + $0x2] ss:$4 sm:$0x7] }
  0x2d   : > { %346 = vrot.lane.b32.xlu1 %v344_v16, %s1187_s17  ;;  %s1189_s17 = smov 127  }
  0x2e   : > { %326 = vrot.lane.b32.xlu0 %v1074_v17, %s1186_s12  ;;  %s1188_s12 = smov 95   ;;  %v1087_v17 = vld [vmem:[%s1326_s10 + $0x1] ss:$4 sm:$0x7] }
  0x31   : > { %397 = vrot.lane.b32.xlu1 %v395_v18, %s1185_s7 }
  0x32   : > { %377 = vrot.lane.b32.xlu0 %v1075_v19, %s1184_s27  ;;  %s1192_s27 = smov 110  }
  0x35   : > { %673 = vrot.lane.b32.xlu1 %v1098_v20, %s1188_s12 }
  0x36   : > { %800 = vrot.lane.b32.xlu0 %v1110_v21, %s1188_s12 }
  0x39   : > { %708 = vrot.lane.b32.xlu1 %v1102_v22, %s1189_s17 }
  0x3a   : > { %754 = vrot.lane.b32.xlu0 %v1106_v23, %s1190_s11 }
  0x3d   : > { %546 = vrot.lane.b32.xlu1 %v1086_v24, %s1188_s12  ;;  %v1091_v24 = vld [vmem:[%s1326_s10 + $0x2] ss:$4 sm:$0x7] }
  0x3e   : > { %627 = vrot.lane.b32.xlu0 %v1094_v25, %s1190_s11 }
  0x41   : > { %581 = vrot.lane.b32.xlu1 %v1090_v26, %s1189_s17 }
  0x42   : > { %500 = vrot.lane.b32.xlu0 %v1082_v27, %s1190_s11  ;;  %v1095_v27 = vld [vmem:[%s1326_s10 + $0x2] ss:$4 sm:$0x7] }
  0x45   : > { %454 = vrot.lane.b32.xlu1 %v1078_v28, %s1189_s17 }
  0x46   : > { %365 = vrot.lane.b32.xlu0 %v363_v29, %s1190_s11 }
  0x49   : > { %313 = vrot.lane.b32.xlu1 %v311_v30, %s1189_s17  ;;  %s1116_s17 = sshll.u32 %s1565_s18, 4 }
  0x4a   : > { %s297_s7 = scalar_lea.vmem %s1557_s5, %s1116_s17 }
  0x7f   : > { %v812_v31 = vpop.permute.xlu1 %811 }
  0x80   : > { %v766_v32 = vpop.permute.xlu0 %765  ;;  %v813_v44 = vrot.slane %v812_v31, 7 }
  0x81   : > { %v767_v34 = vrot.slane %v766_v32, 7 }
  0x82   : > { %v814_v57 = vsel %vm431_vm2, %v813_v44, %v812_v31  ;;  %v425_v31 = vld [vmem:[%s1326_s10] ss:$4 sm:$0x7] }
  0x83   : > { %v768_v35 = vsel %vm380_vm0, %v767_v34, %v766_v32  ;;  %v657_v36 = vpop.permute.xlu1 %656  ;;  %v816_v63 = vmul.f32 %v1111_v53, %v814_v57 }
  0x84   : > { %v770_v38 = vmul.f32 %v1107_v33, %v768_v35  ;;  %v658_v39 = vrot.slane %v657_v36, 7  ;;  %v784_v40 = vpop.permute.xlu0 %783 }
  0x85   : > { %v785_v45 = vrot.slane %v784_v40, 7 }
  0x86   : > { %v659_v47 = vsel %vm400_vm1, %v658_v39, %v657_v36  ;;  %772 = vrot.lane.b32.xlu0 %v770_v38, %s1192_s27  ;;  %v1081_v36 = vld [vmem:[%s1326_s10 + $0x1] ss:$4 sm:$0x7] }
  0x87   : > { %v661_v49 = vmul.f32 %v1097_v37, %v659_v47  ;;  %v786_v50 = vsel %vm400_vm1, %v785_v45, %v784_v40  ;;  %v720_v51 = vpop.permute.xlu1 %719  ;;  %v1077_v40 = vld [vmem:[%s1326_s10 + $0x1] ss:$4 sm:$0x3] }
  0x88   : > { %v788_v54 = vmul.f32 %v1109_v41, %v786_v50  ;;  %v685_v55 = vpop.permute.xlu0 %684  ;;  %v721_v60 = vrot.slane %v720_v51, 7  ;;  %v448_v45 = vmul.f32 %v1077_v40, %v447_v42  ;;  %v1079_v47 = vld [vmem:[%s1326_s10 + $0x1] ss:$4 sm:$0x7] }
  0x89   : > { %v686_v59 = vrot.slane %v685_v55, 7  ;;  %v1083_v50 = vld [vmem:[%s1326_s10 + $0x1] ss:$4 sm:$0x7] }
  0x8a   : > { %663 = vrot.lane.b32.xlu0 %v661_v49, %s1193_s14  ;;  %790 = vrot.lane.b32.xlu1 %v788_v54, %s1193_s14  ;;  %v722_v4 = vsel %vm329_vm4, %v721_v60, %v720_v51  ;;  %450 = vst.msk [vmem:[#allocation2 + $0x11] ss:$8 sm:$0x3] %vm1356_vm3, %v448_v45  ;;  %v1085_v54 = vld [vmem:[%s1326_s10 + $0x1] ss:$4 sm:$0x7] }
  0x8b   : > { %v687_v61 = vsel %vm431_vm2, %v686_v59, %v685_v55  ;;  %v558_v62 = vpop.permute.xlu1 %557  ;;  %v724_v12 = vmul.f32 %v1103_v1, %v722_v4  ;;  %v343_v59 = vld [vmem:[%s1326_s10] ss:$4 sm:$0x7] }
  0x8c   : > { %v689_v0 = vmul.f32 %v1099_v58, %v687_v61  ;;  %v738_v2 = vpop.permute.xlu0 %737  ;;  %v559_v6 = vrot.slane %v558_v62, 7 }
  0x8d   : > { %v739_v5 = vrot.slane %v738_v2, 7 }
  0x8e   : > { %691 = vrot.lane.b32.xlu0 %v689_v0, %s1194_s15  ;;  %818 = vrot.lane.b32.xlu1 %v816_v63, %s1194_s15  ;;  %v560_v18 = vsel %vm431_vm2, %v559_v6, %v558_v62  ;;  %v302_v0 = vld [vmem:[%s1326_s10] ss:$4 sm:$0x3] }
  0x8f   : > { %v740_v9 = vsel %vm349_vm5, %v739_v5, %v738_v2  ;;  %v611_v10 = vpop.permute.xlu1 %610  ;;  %v562_v23 = vmul.f32 %v1087_v17, %v560_v18  ;;  %v303_v2 = vld [vmem:[%s1554_s2] ss:$2 sm:$0x3] }
  0x90   : > { %v742_v13 = vmul.f32 %v1105_v3, %v740_v9  ;;  %v593_v14 = vpop.permute.xlu0 %592  ;;  %v612_v16 = vrot.slane %v611_v10, 7  ;;  %v304_v5 = vmul.f32 %v303_v2, %v302_v0 }
  0x91   : > { %v594_v19 = vrot.slane %v593_v14, 7 }
  0x92   : > { %v613_v20 = vsel %vm349_vm5, %v612_v16, %v611_v10  ;;  %726 = vrot.lane.b32.xlu0 %v724_v12, %s1195_s22  ;;  %744 = vrot.lane.b32.xlu1 %v742_v13, %s1196_s23  ;;  %v374_v10 = vld [vmem:[%s1326_s10] ss:$4 sm:$0x7]  ;;  %309 = vst.msk [vmem:[#allocation2] ss:$8 sm:$0x3] %vm1356_vm3, %v304_v5 }
  0x93   : > { %v615_v21 = vmul.f32 %v1093_v15, %v613_v20  ;;  %v429_v22 = vpop.permute.xlu1 %428  ;;  %v595_v26 = vsel %vm329_vm4, %v594_v19, %v593_v14  ;;  %v394_v19 = vld [vmem:[%s1326_s10] ss:$4 sm:$0x7] }
  0x94   : > { %v639_v25 = vpop.permute.xlu0 %638  ;;  %v430_v29 = vrot.slane %v429_v22, 7  ;;  %v597_v33 = vmul.f32 %v1091_v24, %v595_v26 }
  0x95   : > { %v640_v28 = vrot.slane %v639_v25, 7 }
  0x96   : > { %564 = vrot.lane.b32.xlu0 %v562_v23, %s1194_s15  ;;  %617 = vrot.lane.b32.xlu1 %v615_v21, %s1196_s23  ;;  %v432_v38 = vsel %vm431_vm2, %v430_v29, %v429_v22  ;;  %v414_v23 = vld [vmem:[%s1326_s10] ss:$4 sm:$0x7] }
  0x97   : > { %v641_v30 = vsel %vm380_vm0, %v640_v28, %v639_v25  ;;  %v484_v32 = vpop.permute.xlu1 %483  ;;  %v434_v46 = vmul.f32 %v432_v38, %v425_v31 }
  0x98   : > { %v643_v34 = vmul.f32 %v1095_v27, %v641_v30  ;;  %v466_v35 = vpop.permute.xlu0 %465  ;;  %v485_v37 = vrot.slane %v484_v32, 7 }
  0x99   : > { %v467_v39 = vrot.slane %v466_v35, 7 }
  0x9a   : > { %v486_v41 = vsel %vm349_vm5, %v485_v37, %v484_v32  ;;  %599 = vrot.lane.b32.xlu0 %v597_v33, %s1195_s22  ;;  %645 = vrot.lane.b32.xlu1 %v643_v34, %s1192_s27  ;;  %v1197_v33 = vmov 0   ;;  %v914_v34 = vld [vmem:[%s1555_s3] sm:$0xff] }
  0x9b   : > { %v488_v43 = vmul.f32 %v1081_v36, %v486_v41  ;;  %v530_v44 = vpop.permute.xlu1 %529  ;;  %v468_v49 = vsel %vm329_vm4, %v467_v39, %v466_v35  ;;  %1157 = vset.pattern.permute.xlu0 %v1197_v33  ;;  %1158 = vset.pattern.permute.xlu1 %v1197_v33  ;;  %v922_v35 = vld [vmem:[%s1556_s4] sm:$0xff] }
  0x9c   : > { %v512_v48 = vpop.permute.xlu0 %511  ;;  %v531_v52 = vrot.slane %v530_v44, 7  ;;  %v470_v57 = vmul.f32 %v1079_v47, %v468_v49 }
  0x9d   : > { %v513_v51 = vrot.slane %v512_v48, 7 }
  0x9e   : > { %436 = vrot.lane.b32.xlu0 %v434_v46, %s1194_s15  ;;  %490 = vrot.lane.b32.xlu1 %v488_v43, %s1196_s23  ;;  %v532_v62 = vsel %vm400_vm1, %v531_v52, %v530_v44 }
  0x9f   : > { %v514_v53 = vsel %vm380_vm0, %v513_v51, %v512_v48  ;;  %v347_v55 = vpop.permute.xlu1 %346  ;;  %v534_v6 = vmul.f32 %v1085_v54, %v532_v62 }
  0xa0   : > { %v516_v58 = vmul.f32 %v1083_v50, %v514_v53  ;;  %v348_v60 = vrot.slane %v347_v55, 7  ;;  %v327_v61 = vpop.permute.xlu0 %326 }
  0xa1   : > { %v328_v63 = vrot.slane %v327_v61, 7 }
  0xa2   : > { %v350_v1 = vsel %vm349_vm5, %v348_v60, %v347_v55  ;;  %472 = vrot.lane.b32.xlu0 %v470_v57, %s1195_s22  ;;  %518 = vrot.lane.b32.xlu1 %v516_v58, %s1192_s27 }
  0xa3   : > { %v352_v3 = vmul.f32 %v350_v1, %v343_v59  ;;  %v398_v4 = vpop.permute.xlu1 %397  ;;  %v330_v9 = vsel %vm329_vm4, %v328_v63, %v327_v61 }
  0xa4   : > { %v378_v8 = vpop.permute.xlu0 %377  ;;  %v399_v12 = vrot.slane %v398_v4, 7  ;;  %v332_v15 = vmul.f32 %v330_v9, %v322_v7 }
  0xa5   : > { %v379_v11 = vrot.slane %v378_v8, 7 }
  0xa6   : > { %536 = vrot.lane.b32.xlu0 %v534_v6, %s1193_s14  ;;  %354 = vrot.lane.b32.xlu1 %v352_v3, %s1196_s23  ;;  %v401_v20 = vsel %vm400_vm1, %v399_v12, %v398_v4 }
  0xa7   : > { %v381_v13 = vsel %vm380_vm0, %v379_v11, %v378_v8  ;;  %v674_v14 = vpop.permute.xlu1 %673  ;;  %v403_v26 = vmul.f32 %v401_v20, %v394_v19 }
  0xa8   : > { %v383_v16 = vmul.f32 %v381_v13, %v374_v10  ;;  %v801_v17 = vpop.permute.xlu0 %800  ;;  %v675_v18 = vrot.slane %v674_v14, 1 }
  0xa9   : > { %v802_v21 = vrot.slane %v801_v17, 1 }
  0xaa   : > { %334 = vrot.lane.b32.xlu0 %v332_v15, %s1195_s22  ;;  %385 = vrot.lane.b32.xlu1 %v383_v16, %s1192_s27  ;;  %v676_v22 = vsel %vm419_vm6, %v674_v14, %v675_v18 }
  0xab   : > { %v803_v24 = vsel %vm419_vm6, %v801_v17, %v802_v21  ;;  %679 = vst.msk [vmem:[#allocation2 + $0x31] ss:$8 sm:$0x3] %vm1356_vm3, %v676_v22  ;;  %v709_v25 = vpop.permute.xlu1 %708 }
  0xac   : > { %806 = vst.msk [vmem:[#allocation2 + $0x42] ss:$8 sm:$0x3] %vm1356_vm3, %v803_v24  ;;  %v755_v27 = vpop.permute.xlu0 %754  ;;  %v710_v28 = vrot.slane %v709_v25, 1 }
  0xad   : > { %v756_v29 = vrot.slane %v755_v27, 1 }
  0xae   : > { %405 = vrot.lane.b32.xlu0 %v403_v26, %s1193_s14  ;;  %416 = vrot.lane.b32.xlu1 %v414_v23, %s1188_s12  ;;  %v711_v30 = vsel %vm316_vm7, %v709_v25, %v710_v28 }
  0xaf   : > { %v757_v31 = vsel %vm368_vm8, %v755_v27, %v756_v29  ;;  %714 = vst.msk [vmem:[#allocation2 + $0x34] ss:$8 sm:$0x3] %vm1356_vm3, %v711_v30  ;;  %v547_v32 = vpop.permute.xlu1 %546 }
  0xb0   : > { %760 = vst.msk [vmem:[#allocation2 + $0x37] ss:$8 sm:$0x3] %vm1356_vm3, %v757_v31  ;;  %v628_v36 = vpop.permute.xlu0 %627  ;;  %v548_v37 = vrot.slane %v547_v32, 1 }
  0xb1   : > { %v629_v38 = vrot.slane %v628_v36, 1 }
  0xb2   : > { %v549_v39 = vsel %vm419_vm6, %v547_v32, %v548_v37  ;;  %917 = vperm.xlu0 %1157, %v914_v34   ;;  %925 = vperm.xlu1 %1158, %v922_v35  }
  0xb3   : > { %v630_v40 = vsel %vm368_vm8, %v628_v36, %v629_v38  ;;  %552 = vst.msk [vmem:[#allocation2 + $0x20] ss:$8 sm:$0x3] %vm1356_vm3, %v549_v39  ;;  %v582_v41 = vpop.permute.xlu1 %581 }
  0xb4   : > { %633 = vst.msk [vmem:[#allocation2 + $0x26] ss:$8 sm:$0x3] %vm1356_vm3, %v630_v40  ;;  %v583_v42 = vrot.slane %v582_v41, 1  ;;  %v501_v43 = vpop.permute.xlu0 %500 }
  0xb5   : > { %v502_v44 = vrot.slane %v501_v43, 1 }
  0xb6   : > { %v584_v45 = vsel %vm316_vm7, %v582_v41, %v583_v42 }
  0xb7   : > { %587 = vst.msk [vmem:[#allocation2 + $0x23] ss:$8 sm:$0x3] %vm1356_vm3, %v584_v45  ;;  %v503_v46 = vsel %vm368_vm8, %v501_v43, %v502_v44  ;;  %v455_v47 = vpop.permute.xlu1 %454 }
  0xb8   : > { %506 = vst.msk [vmem:[#allocation2 + $0x15] ss:$8 sm:$0x3] %vm1356_vm3, %v503_v46  ;;  %v456_v48 = vrot.slane %v455_v47, 1  ;;  %v366_v49 = vpop.permute.xlu0 %365 }
  0xb9   : > { %v367_v50 = vrot.slane %v366_v49, 1 }
  0xba   : > { %v457_v51 = vsel %vm316_vm7, %v455_v47, %v456_v48 }
  0xbb   : > { %460 = vst.msk [vmem:[#allocation2 + $0x12] ss:$8 sm:$0x3] %vm1356_vm3, %v457_v51  ;;  %v369_v52 = vsel %vm368_vm8, %v366_v49, %v367_v50  ;;  %v314_v53 = vpop.permute.xlu1 %313 }
  0xbc   : > { %372 = vst.msk [vmem:[#allocation2 + $0x4] ss:$8 sm:$0x3] %vm1356_vm3, %v369_v52  ;;  %v315_v54 = vrot.slane %v314_v53, 1 }
  0xbe   : > { %v317_v55 = vsel %vm316_vm7, %v314_v53, %v315_v54 }
  0xbf   : > { %320 = vst.msk [vmem:[#allocation2 + $0x1] ss:$8 sm:$0x3] %vm1356_vm3, %v317_v55 }
  0xf8   : > { %v773_v57 = vpop.permute.xlu0 %772 }
  0xf9   : > { %v774_v58 = vrot.slane %v773_v57, 1 }
  0xfb   : > { %v775_v59 = vsel %vm388_vm9, %v773_v57, %v774_v58 }
  0xfc   : > { %778 = vst.msk [vmem:[#allocation2 + $0x40] ss:$8 sm:$0x3] %vm1356_vm3, %v775_v59  ;;  %v664_v60 = vpop.permute.xlu0 %663  ;;  %v791_v61 = vpop.permute.xlu1 %790 }
  0xfd   : > { %v665_v62 = vrot.slane %v664_v60, 1  ;;  %v792_v63 = vrot.slane %v791_v61, 1 }
  0xff   : > { %v666_v0 = vsel %vm408_vm10, %v664_v60, %v665_v62  ;;  %v793_v1 = vsel %vm408_vm10, %v791_v61, %v792_v63 }
 0x100   : > { %669 = vst.msk [vmem:[#allocation2 + $0x30] ss:$8 sm:$0x3] %vm1356_vm3, %v666_v0  ;;  %796 = vst.msk [vmem:[#allocation2 + $0x41] ss:$8 sm:$0x3] %vm1356_vm3, %v793_v1  ;;  %v692_v2 = vpop.permute.xlu0 %691  ;;  %v819_v3 = vpop.permute.xlu1 %818 }
 0x101   : > { %v693_v4 = vrot.slane %v692_v2, 1  ;;  %v820_v5 = vrot.slane %v819_v3, 1 }
 0x103   : > { %v694_v6 = vsel %vm439_vm11, %v692_v2, %v693_v4  ;;  %v821_v7 = vsel %vm439_vm11, %v819_v3, %v820_v5  ;;  %v828_v3 = vld [vmem:[%s1553_s1] sm:$0xff] }
 0x104   : > { %697 = vst.msk [vmem:[#allocation2 + $0x32] ss:$8 sm:$0x3] %vm1356_vm3, %v694_v6  ;;  %824 = vst.msk [vmem:[#allocation2 + $0x43] ss:$8 sm:$0x3] %vm1356_vm3, %v821_v7  ;;  %v727_v8 = vpop.permute.xlu0 %726  ;;  %v745_v9 = vpop.permute.xlu1 %744 }
 0x105   : > { %v728_v10 = vrot.slane %v727_v8, 1  ;;  %v746_v11 = vrot.slane %v745_v9, 1 }
 0x107   : > { %v729_v12 = vsel %vm337_vm12, %v727_v8, %v728_v10  ;;  %v747_v13 = vsel %vm357_vm13, %v745_v9, %v746_v11 }
 0x108   : > { %732 = vst.msk [vmem:[#allocation2 + $0x35] ss:$8 sm:$0x3] %vm1356_vm3, %v729_v12  ;;  %750 = vst.msk [vmem:[#allocation2 + $0x36] ss:$8 sm:$0x3] %vm1356_vm3, %v747_v13  ;;  %v565_v14 = vpop.permute.xlu0 %564  ;;  %v618_v15 = vpop.permute.xlu1 %617 }
 0x109   : > { %v566_v16 = vrot.slane %v565_v14, 1  ;;  %v619_v17 = vrot.slane %v618_v15, 1 }
 0x10b   : > { %v567_v18 = vsel %vm439_vm11, %v565_v14, %v566_v16  ;;  %v620_v19 = vsel %vm357_vm13, %v618_v15, %v619_v17  ;;  %v838_v20 = vld [vmem:[#allocation2 + $0x48] sm:$0xff]  ;;  %v837_v21 = vld [vmem:[#allocation2 + $0x40] sm:$0xff] }
 0x10c   : > { %570 = vst.msk [vmem:[#allocation2 + $0x21] ss:$8 sm:$0x3] %vm1356_vm3, %v567_v18  ;;  %623 = vst.msk [vmem:[#allocation2 + $0x25] ss:$8 sm:$0x3] %vm1356_vm3, %v620_v19  ;;  %v600_v22 = vpop.permute.xlu0 %599  ;;  %865 = vmatprep.subr.mxu0 %v838_v20  ;;  %v646_v23 = vpop.permute.xlu1 %645 }
 0x10d   : > { %v601_v24 = vrot.slane %v600_v22, 1  ;;  %v647_v25 = vrot.slane %v646_v23, 1  ;;  %866 = vmatpush1.msra.mxu0 %v837_v21 }
 0x10f   : > { %v602_v26 = vsel %vm337_vm12, %v600_v22, %v601_v24  ;;  %v648_v27 = vsel %vm388_vm9, %v646_v23, %v647_v25  ;;  %v836_v28 = vld [vmem:[#allocation2 + $0x38] sm:$0xff]  ;;  %v835_v29 = vld [vmem:[#allocation2 + $0x30] sm:$0xff] }
 0x110   : > { %605 = vst.msk [vmem:[#allocation2 + $0x24] ss:$8 sm:$0x3] %vm1356_vm3, %v602_v26  ;;  %651 = vst.msk [vmem:[#allocation2 + $0x27] ss:$8 sm:$0x3] %vm1356_vm3, %v648_v27  ;;  %v437_v30 = vpop.permute.xlu0 %436  ;;  %867 = vmatprep.subr.mxu0 %v836_v28  ;;  %v491_v31 = vpop.permute.xlu1 %490 }
 0x111   : > { %v438_v32 = vrot.slane %v437_v30, 1  ;;  %v492_v33 = vrot.slane %v491_v31, 1  ;;  %868 = vmatpush1.msra.mxu0 %v835_v29 }
 0x113   : > { %v440_v34 = vsel %vm439_vm11, %v437_v30, %v438_v32  ;;  %v493_v35 = vsel %vm357_vm13, %v491_v31, %v492_v33 }
 0x114   : > { %443 = vst.msk [vmem:[#allocation2 + $0x10] ss:$8 sm:$0x3] %vm1356_vm3, %v440_v34  ;;  %496 = vst.msk [vmem:[#allocation2 + $0x14] ss:$8 sm:$0x3] %vm1356_vm3, %v493_v35  ;;  %v473_v36 = vpop.permute.xlu0 %472  ;;  %v519_v37 = vpop.permute.xlu1 %518 }
 0x115   : > { %v474_v38 = vrot.slane %v473_v36, 1  ;;  %v520_v39 = vrot.slane %v519_v37, 1 }
 0x117   : > { %v475_v40 = vsel %vm337_vm12, %v473_v36, %v474_v38  ;;  %v521_v41 = vsel %vm388_vm9, %v519_v37, %v520_v39  ;;  %v834_v42 = vld [vmem:[#allocation2 + $0x28] sm:$0xff]  ;;  %v833_v43 = vld [vmem:[#allocation2 + $0x20] sm:$0xff] }
 0x118   : > { %478 = vst.msk [vmem:[#allocation2 + $0x13] ss:$8 sm:$0x3] %vm1356_vm3, %v475_v40  ;;  %524 = vst.msk [vmem:[#allocation2 + $0x16] ss:$8 sm:$0x3] %vm1356_vm3, %v521_v41  ;;  %v537_v44 = vpop.permute.xlu0 %536  ;;  %869 = vmatprep.subr.mxu0 %v834_v42  ;;  %v355_v45 = vpop.permute.xlu1 %354 }
 0x119   : > { %v538_v46 = vrot.slane %v537_v44, 1  ;;  %v356_v47 = vrot.slane %v355_v45, 1  ;;  %870 = vmatpush1.msra.mxu0 %v833_v43 }
 0x11b   : > { %v539_v48 = vsel %vm408_vm10, %v537_v44, %v538_v46  ;;  %v358_v49 = vsel %vm357_vm13, %v355_v45, %v356_v47 }
 0x11c   : > { %542 = vst.msk [vmem:[#allocation2 + $0x17] ss:$8 sm:$0x3] %vm1356_vm3, %v539_v48  ;;  %361 = vst.msk [vmem:[#allocation2 + $0x3] ss:$8 sm:$0x3] %vm1356_vm3, %v358_v49  ;;  %v335_v50 = vpop.permute.xlu0 %334  ;;  %v386_v51 = vpop.permute.xlu1 %385 }
 0x11d   : > { %v336_v52 = vrot.slane %v335_v50, 1  ;;  %v387_v53 = vrot.slane %v386_v51, 1 }
 0x11f   : > { %v338_v54 = vsel %vm337_vm12, %v335_v50, %v336_v52  ;;  %v389_v55 = vsel %vm388_vm9, %v386_v51, %v387_v53 }
 0x120   : > { %341 = vst.msk [vmem:[#allocation2 + $0x2] ss:$8 sm:$0x3] %vm1356_vm3, %v338_v54  ;;  %392 = vst.msk [vmem:[#allocation2 + $0x5] ss:$8 sm:$0x3] %vm1356_vm3, %v389_v55  ;;  %v406_v57 = vpop.permute.xlu0 %405  ;;  %v417_v58 = vpop.permute.xlu1 %416 }
 0x121   : > { %v407_v59 = vrot.slane %v406_v57, 1  ;;  %v418_v60 = vrot.slane %v417_v58, 1 }
 0x123   : > { %v409_v61 = vsel %vm408_vm10, %v406_v57, %v407_v59  ;;  %v420_v62 = vsel %vm419_vm6, %v417_v58, %v418_v60  ;;  %v832_v63 = vld [vmem:[#allocation2 + $0x18] sm:$0xff]  ;;  %v831_v0 = vld [vmem:[#allocation2 + $0x10] sm:$0xff] }
 0x124   : > { %412 = vst.msk [vmem:[#allocation2 + $0x6] ss:$8 sm:$0x3] %vm1356_vm3, %v409_v61  ;;  %423 = vst.msk [vmem:[#allocation2 + $0x7] ss:$8 sm:$0x3] %vm1356_vm3, %v420_v62  ;;  %871 = vmatprep.subr.mxu0 %v832_v63 }
 0x125   : > { %872 = vmatpush1.msra.mxu0 %v831_v0 }
 0x12b   : > { %v830_v1 = vld [vmem:[#allocation2 + $0x8] sm:$0xff]  ;;  %v829_v2 = vld [vmem:[#allocation2] sm:$0xff] }
 0x12c   : > { %873 = vmatprep.subr.mxu0 %v830_v1 }
 0x12d   : > { %874 = vmatpush1.msra.mxu0 %v829_v2  ;;  %v918_v4 = vpop.permute.xlu0 %917  ;;  %v926_v6 = vpop.permute.xlu1 %925 }
 0x12e   : > { %1113 = vmatmul.mubr.msk.f32.vlgmr.msra.gmra.mxu0 %vm839_vm14, %v828_v3 }
 0x1ee   : > { %v909_v5 = vpop.f32.mrf.mxu0 }
 0x1ef   : > { %v920_v7 = vmul.f32 %v918_v4, %v909_v5 }
 0x1f0   : > { %v911_v8 = vpop.f32.mrf.mxu0 }
 0x1f1   : > { %v928_v56 = vadd.f32 %v926_v6, %v920_v7  ;;  %v921_v9 = vmul.f32 %v918_v4, %v911_v8 }
 0x1f3   : > { %v930_v10 = vmax.f32 %v928_v56, 0.0  ;;  %v929_v11 = vadd.f32 %v926_v6, %v921_v9 }
 0x1f5   : > { %932 = vst [vmem:[%s297_s7] sm:$0xff] %v930_v10  ;;  %v931_v12 = vmax.f32 %v929_v11, 0.0 }
 0x1f7   : > { %933 = vst [vmem:[%s297_s7 + $0x8] sm:$0xff] %v931_v12 }
 0x1f8 PF: > { %s15_s20 = sadd.s32 1, %s1181_s20   ;;  %s1560_s18 = smov %s1177_s19 }
 0x1f9   : > { %p12_p5 = scmp.ge.s32.totalorder %s15_s20, 4   ;;  %s1561_s19 = smov %s1563_s21 }
 0x1fb   :  { %14 = sbr.rel (!%p12_p5) target bundleno = 2 (0x2), region = 122 }

</bundles_post_ra>
